<compile_context>
chip_gen: v6e
topology: v6e:2x2x1
jax: 0.10.0
libtpu: 0.0.40
codegen_flags: <defaults>
</compile_context>

<pallas_src>
import jax
import jax.numpy as jnp
import numpy as np
from jax.experimental import pallas as pl
from jax.experimental.pallas import tpu as pltpu


def _round_up(x, m):
    return ((x + m - 1) // m) * m


def _tpu_generation():
    """Best-effort TPU generation from device_kind (used only for tile/dtype choices)."""
    try:
        kind = jax.devices()[0].device_kind.lower()
    except Exception:
        return 6
    for g in range(9, 1, -1):
        if f"v{g}" in kind or f"tpu{g}" in kind:
            return g
    return 6


# ----------------------------------------------------------------------------
# Kernel 1: feature pipeline (conv -> bn1 -> relu -> fc -> bn2 -> relu),
# channel-slab streamed with an f32 VMEM accumulator.
# ----------------------------------------------------------------------------
def make_feature_kernel(K, Cc, single_target, tap_dtype):
    assert K % 2 == 1, (
        "even kernel_size is not supported: PyTorch Conv1d(padding=K//2) with even K "
        "changes the sequence length")
    pad = K // 2

    def _shift_views(x, TB, Dp):
        # view[k][:, d] == x[:, d + k - pad], zero outside [0, Dp)
        views = []
        for k in range(K):
            off = k - pad
            if off == 0:
                views.append(x)
            elif off > 0:
                views.append(jnp.concatenate(
                    [x[:, off:], jnp.zeros((TB, off), x.dtype)], axis=1))
            else:
                views.append(jnp.concatenate(
                    [jnp.zeros((TB, -off), x.dtype), x[:, :off]], axis=1))
        return views

    def _body(h_ref, r_ref, t_ref, fcw_ref, fcb_ref, convw_ref, convb_ref,
              y_out, st_out, acc_ref):
        c_slab = pl.program_id(1)

        @pl.when(c_slab == 0)
        def _():
            acc_ref[...] = jnp.zeros_like(acc_ref)

        # bn_init/bn0 already folded/applied in the wrapper; inputs arrive bf16.
        x0 = h_ref[...].astype(tap_dtype)          # (TB, Dp)
        x1 = r_ref[...].astype(tap_dtype)
        TB, Dp = x0.shape

        # Hoist the 2*K shifted views out of the channel loop (2K slices per slab).
        x0_sh = _shift_views(x0, TB, Dp)
        x1_sh = _shift_views(x1, TB, Dp)

        base = c_slab * Cc
        for lc in range(Cc):
            cg = base + lc                          # global channel index
            wbase = cg * (2 * K)
            # per-channel conv (bn1 folded), tap accumulation in tap_dtype
            tap = jnp.zeros((TB, Dp), tap_dtype) + convb_ref[cg].astype(tap_dtype)
            for k in range(K):
                w0 = convw_ref[wbase + k].astype(tap_dtype)
                w1 = convw_ref[wbase + K + k].astype(tap_dtype)
                tap = tap + w0 * x0_sh[k] + w1 * x1_sh[k]
            feat = jnp.maximum(tap, 0).astype(jnp.bfloat16)
            # feed the channel block straight into its (D, D) slab of the fc weight
            acc_ref[...] += jnp.dot(feat, fcw_ref[lc],
                                    preferred_element_type=jnp.float32)

        @pl.when(c_slab == pl.num_programs(1) - 1)
        def _():
            # fused (fc bias * bn2_scale + bn2_shift) and ReLU
            y = jnp.maximum(acc_ref[...] + fcb_ref[...], 0.0)
            if single_target:
                # score[b] = y[b] . ent_embed[t[b]] -- no (B, n_ent) matrix is formed
                st_out[...] = jnp.sum(y * t_ref[...].astype(jnp.float32),
                                      axis=-1, keepdims=True)
            else:
                y_out[...] = y.astype(y_out.dtype)

    if single_target:
        def kernel(h_ref, r_ref, t_ref, fcw_ref, fcb_ref, convw_ref, convb_ref,
                   st_out, acc_ref):
            _body(h_ref, r_ref, t_ref, fcw_ref, fcb_ref, convw_ref, convb_ref,
                  None, st_out, acc_ref)
    else:
        def kernel(h_ref, r_ref, fcw_ref, fcb_ref, convw_ref, convb_ref,
                   y_out, acc_ref):
            _body(h_ref, r_ref, None, fcw_ref, fcb_ref, convw_ref, convb_ref,
                  y_out, None, acc_ref)
    return kernel


# ----------------------------------------------------------------------------
# Kernel 2: tiled all-entity scoring   score = y @ ent_embed^T   (bf16 -> f32 acc)
# ----------------------------------------------------------------------------
def score_kernel(y_ref, ew_ref, out_ref):
    out_ref[...] = jax.lax.dot_general(
        y_ref[...], ew_ref[...], (((1,), (1,)), ((), ())),
        preferred_element_type=jnp.float32).astype(out_ref.dtype)


# ----------------------------------------------------------------------------
# Wrapper: embedding gathers, BN folding, padding, pallas_call plumbing
# ----------------------------------------------------------------------------
def convtranse_forward(h_idx, r_idx, t, params, *, TB=None, TN=2048,
                       score_dtype=jnp.float32, trim_output=True):
    ent_w = params["ent_w"]                        # (n_ent, D)
    rel_w = params["rel_w"]                        # (2*n_rel, D)
    n_ent, D = ent_w.shape
    C, _, K = params["conv_w"].shape
    B = h_idx.shape[0]

    gen = _tpu_generation()
    tap_dtype = jnp.bfloat16 if gen >= 6 else jnp.float32   # no bf16 VPU on v5e/older
    if TB is None:
        TB = 256 if gen >= 6 else 128
    TB = min(TB, _round_up(B, 128))
    B_pad = _round_up(B, TB)
    D_pad = _round_up(D, 128)                      # lane-dense last dim everywhere

    # ---- fold bn_init + bn0 into one per-input-channel affine, applied at gather time
    s_init = params["bn_init_scale"][0]
    b_init = params["bn_init_shift"][0]
    s0, b0 = params["bn0_scale"], params["bn0_shift"]
    h_scale, h_shift = s_init * s0[0], b_init * s0[0] + b0[0]
    r_scale, r_shift = s0[1], b0[1]

    pad_bd = ((0, B_pad - B), (0, D_pad - D))
    h_emb = jnp.take(ent_w, h_idx, axis=0).astype(jnp.float32) * h_scale + h_shift
    r_emb = jnp.take(rel_w, r_idx, axis=0).astype(jnp.float32) * r_scale + r_shift
    h_emb = jnp.pad(h_emb, pad_bd).astype(jnp.bfloat16)
    r_emb = jnp.pad(r_emb, pad_bd).astype(jnp.bfloat16)

    single_target = (t.ndim == 1)
    if single_target:
        t_emb = jnp.take(ent_w, t, axis=0).astype(jnp.float32)
        t_emb = jnp.pad(t_emb, pad_bd).astype(jnp.bfloat16)

    # ---- channel slab size: ~2 MiB of bf16 fc weight per slab (double-buffered ~4 MiB)
    Cc = max(1, min(C, (2 << 20) // (D_pad * D_pad * 2)))
    C_pad = _round_up(C, Cc)
    n_cs = C_pad // Cc

    # ---- fold bn1 into conv weights/bias (zero-padded channels contribute nothing)
    s1, b1 = params["bn1_scale"], params["bn1_shift"]
    conv_w_f = params["conv_w"].astype(jnp.float32) * s1[:, None, None]      # (C,2,K)
    conv_w_f = jnp.pad(conv_w_f, ((0, C_pad - C), (0, 0), (0, 0))).reshape(-1)
    conv_b_f = jnp.pad(params["conv_b"].astype(jnp.float32) * s1 + b1, (0, C_pad - C))

    # ---- fold bn2 into fc weight columns + fused bias, reshape to (C_pad, D_pad, D_pad)
    s2, b2 = params["bn2_scale"], params["bn2_shift"]
    fc_wT = (params["fc_w"].T.astype(jnp.float32) * s2[None, :]).reshape(C, D, D)
    fc_wT = jnp.pad(fc_wT, ((0, C_pad - C), (0, D_pad - D), (0, D_pad - D)))
    fc_wT = fc_wT.astype(jnp.bfloat16)
    fc_b_f = jnp.pad(params["fc_b"].astype(jnp.float32) * s2 + b2,
                     (0, D_pad - D)).reshape(1, D_pad)

    smem_spec = pl.BlockSpec(memory_space=pltpu.MemorySpace.SMEM)
    row_spec = pl.BlockSpec((TB, D_pad), lambda i, c: (i, 0))
    fcw_spec = pl.BlockSpec((Cc, D_pad, D_pad), lambda i, c: (c, 0, 0))
    fcb_spec = pl.BlockSpec((1, D_pad), lambda i, c: (0, 0))
    feat_params = pltpu.CompilerParams(
        dimension_semantics=("parallel", "arbitrary"))
    grid = (B_pad // TB, n_cs)
    scratch = [pltpu.VMEM((TB, D_pad), jnp.float32)]

    if single_target:
        st = pl.pallas_call(
            make_feature_kernel(K, Cc, True, tap_dtype),
            out_shape=jax.ShapeDtypeStruct((B_pad, 1), jnp.float32),
            grid_spec=pltpu.PrefetchScalarGridSpec(
                num_scalar_prefetch=0, grid=grid,
                in_specs=[row_spec, row_spec, row_spec,
                          fcw_spec, fcb_spec, smem_spec, smem_spec],
                out_specs=pl.BlockSpec((TB, 1), lambda i, c: (i, 0)),
                scratch_shapes=scratch),
            compiler_params=feat_params,
        )(h_emb, r_emb, t_emb, fc_wT, fc_b_f, conv_w_f, conv_b_f)
        return st[:B, 0]

    y_bf16 = pl.pallas_call(
        make_feature_kernel(K, Cc, False, tap_dtype),
        out_shape=jax.ShapeDtypeStruct((B_pad, D_pad), jnp.bfloat16),
        grid_spec=pltpu.PrefetchScalarGridSpec(
            num_scalar_prefetch=0, grid=grid,
            in_specs=[row_spec, row_spec,
                      fcw_spec, fcb_spec, smem_spec, smem_spec],
            out_specs=row_spec,
            scratch_shapes=scratch),
        compiler_params=feat_params,
    )(h_emb, r_emb, fc_wT, fc_b_f, conv_w_f, conv_b_f)

    # ---- all-entity scoring: tiled y @ ent_embed^T, minimal n_ent padding
    n_ent_128 = _round_up(n_ent, 128)
    if n_ent_128 <= TN:
        TN = n_ent_128
        n_ent_pad = n_ent_128
    else:
        n_ent_pad = _round_up(n_ent, TN)
    ent_bf16 = jnp.pad(ent_w.astype(jnp.bfloat16),
                       ((0, n_ent_pad - n_ent), (0, D_pad - D)))

    score = pl.pallas_call(
        score_kernel,
        out_shape=jax.ShapeDtypeStruct((B_pad, n_ent_pad), score_dtype),
        grid_spec=pltpu.PrefetchScalarGridSpec(
            num_scalar_prefetch=0,
            grid=(B_pad // TB, n_ent_pad // TN),
            in_specs=[pl.BlockSpec((TB, D_pad), lambda i, j: (i, 0)),
                      pl.BlockSpec((TN, D_pad), lambda i, j: (j, 0))],
            out_specs=pl.BlockSpec((TB, TN), lambda i, j: (i, j))),
        compiler_params=pltpu.CompilerParams(
            dimension_semantics=("parallel", "parallel")),   # no accumulation; v7x 2-TC
    )(y_bf16, ent_bf16)

    if trim_output and (B_pad != B or n_ent_pad != n_ent):
        # Exact module semantics need (B, n_ent); callers that can mask padded
        # rows/cols themselves should pass trim_output=False to avoid this copy.
        score = score[:B, :n_ent]
    return score


# ----------------------------------------------------------------------------
# Deterministic parameter init (synthetic; shapes follow the module's __init__)
# ----------------------------------------------------------------------------
def init_params(key, n_ent, n_rel, dim, channels, kernel_size):
    ks = jax.random.split(key, 10)
    eps = 1e-5

    def xavier(k, shape):
        std = np.sqrt(2.0 / (shape[0] + shape[1]))
        return (jax.random.normal(k, shape) * std).astype(jnp.float32)

    def bn_fold(k, n):
        k1, k2, k3, k4 = jax.random.split(k, 4)
        gamma = 1.0 + 0.1 * jax.random.normal(k1, (n,))
        beta = 0.1 * jax.random.normal(k2, (n,))
        rmean = 0.1 * jax.random.normal(k3, (n,))
        rvar = 1.0 + 0.1 * jnp.abs(jax.random.normal(k4, (n,)))
        scale = gamma / jnp.sqrt(rvar + eps)
        shift = beta - rmean * scale
        return scale.astype(jnp.float32), shift.astype(jnp.float32)

    params = {
        "ent_w": xavier(ks[0], (n_ent, dim)),
        "rel_w": xavier(ks[1], (2 * n_rel, dim)),
        "conv_w": (0.2 * jax.random.normal(ks[2], (channels, 2, kernel_size))).astype(jnp.float32),
        "conv_b": (0.1 * jax.random.normal(ks[3], (channels,))).astype(jnp.float32),
        "fc_w": (jax.random.normal(ks[4], (dim, channels * dim)) /
                 np.sqrt(channels * dim)).astype(jnp.float32),
        "fc_b": (0.1 * jax.random.normal(ks[5], (dim,))).astype(jnp.float32),
    }
    params["bn_init_scale"], params["bn_init_shift"] = bn_fold(ks[6], 1)
    params["bn0_scale"], params["bn0_shift"] = bn_fold(ks[7], 2)
    params["bn1_scale"], params["bn1_shift"] = bn_fold(ks[8], channels)
    params["bn2_scale"], params["bn2_shift"] = bn_fold(ks[9], dim)
    return params


# ----------------------------------------------------------------------------
# Pure-JAX reference (correctness check only, full f32 / HIGHEST precision)
# ----------------------------------------------------------------------------
def reference_forward(h_idx, r_idx, t, p):
    HI = jax.lax.Precision.HIGHEST
    he = p["ent_w"][h_idx]
    re = p["rel_w"][r_idx]
    he = he * p["bn_init_scale"][0] + p["bn_init_shift"][0]
    x = jnp.stack([he, re], axis=1)                                   # (B, 2, D)
    x = x * p["bn0_scale"][None, :, None] + p["bn0_shift"][None, :, None]
    pad = p["conv_w"].shape[-1] // 2
    x = jax.lax.conv_general_dilated(
        x, p["conv_w"], window_strides=(1,), padding=[(pad, pad)],
        dimension_numbers=("NCH", "OIH", "NCH"), precision=HI)
    x = x + p["conv_b"][None, :, None]
    x = jnp.maximum(x * p["bn1_scale"][None, :, None] + p["bn1_shift"][None, :, None], 0.0)
    x = x.reshape(x.shape[0], -1)                                     # (B, C*D)
    x = jnp.dot(x, p["fc_w"].T, precision=HI) + p["fc_b"]
    x = jnp.maximum(x * p["bn2_scale"] + p["bn2_shift"], 0.0)
    score_all = jnp.dot(x, p["ent_w"].T, precision=HI)
    if t.ndim == 1:
        return score_all[jnp.arange(x.shape[0]), t]
    return score_all


if __name__ == "__main__":
    n_ent, n_rel, dim, channels, kernel_size = 64, 8, 32, 4, 3
    B = 16

    key = jax.random.PRNGKey(0)
    kp, kh, kr, kt = jax.random.split(key, 4)
    params = init_params(kp, n_ent, n_rel, dim, channels, kernel_size)

    h_idx = jax.random.randint(kh, (B,), 0, n_ent)
    r_idx = jax.random.randint(kr, (B,), 0, 2 * n_rel)
    t_1d = jax.random.randint(kt, (B,), 0, n_ent)
    t_2d = jnp.zeros((B, n_ent), jnp.float32)   # only its ndim matters (all-entity scoring)

    # all-entity scoring branch (torch.mm path)
    score_all = jax.block_until_ready(convtranse_forward(h_idx, r_idx, t_2d, params))
    # single-target branch (sum(x * t) path)
    score_1d = jax.block_until_ready(convtranse_forward(h_idx, r_idx, t_1d, params))

    ref_all = reference_forward(h_idx, r_idx, t_2d, params)
    ref_1d = reference_forward(h_idx, r_idx, t_1d, params)

    # 2e-2 tolerance is due to the intentional bf16 operands (taps / MXU matmuls)
    # vs the HIGHEST-precision f32 reference.
    np.testing.assert_allclose(np.asarray(score_all), np.asarray(ref_all), rtol=2e-2, atol=2e-2)
    np.testing.assert_allclose(np.asarray(score_1d), np.asarray(ref_1d), rtol=2e-2, atol=2e-2)

    print("KERNEL_OK")
</pallas_src>

<mosaic_0001>
module attributes {stable_mosaic.version = 11 : i64} {
  func.func @kernel(%arg0: i32, %arg1: i32, %arg2: memref<128x128xbf16, #tpu.memory_space<vmem>>, %arg3: memref<128x128xbf16, #tpu.memory_space<vmem>>, %arg4: memref<4x128x128xbf16, #tpu.memory_space<vmem>>, %arg5: memref<1x128xf32, #tpu.memory_space<vmem>>, %arg6: memref<24xf32, #tpu.memory_space<smem>>, %arg7: memref<4xf32, #tpu.memory_space<smem>>, %arg8: memref<128x128xbf16, #tpu.memory_space<vmem>>, %arg9: memref<128x128xf32, #tpu.memory_space<vmem>>) attributes {dimension_semantics = [#tpu.dimension_semantics<parallel>, #tpu.dimension_semantics<arbitrary>], iteration_bounds = array<i64: 1, 1>, scalar_prefetch = 0 : i64, scratch_operands = 1 : i64, tpu.core_type = #tpu.core_type<tc>, window_params = [{transform_indices = @transform_0, window_bounds = array<i64: 128, 128>}, {transform_indices = @transform_1, window_bounds = array<i64: 128, 128>}, {transform_indices = @transform_2, window_bounds = array<i64: 4, 128, 128>}, {pipeline_mode = #tpu.pipeline_mode<synchronous>, transform_indices = @transform_3, window_bounds = array<i64: 1, 128>}, {transform_indices = @transform_4, window_bounds = array<i64: 24>}, {transform_indices = @transform_5, window_bounds = array<i64: 4>}, {transform_indices = @transform_6, window_bounds = array<i64: 128, 128>}]} {
    %c0_i32 = arith.constant 0 : i32
    %0 = arith.cmpi eq, %arg1, %c0_i32 : i32
    %1 = arith.extui %0 : i1 to i32
    %c0_i32_0 = arith.constant 0 : i32
    %2 = arith.cmpi ne, %1, %c0_i32_0 : i32
    scf.if %2 {
      %cst_86 = arith.constant 0.000000e+00 : f32
      %265 = vector.broadcast %cst_86 : f32 to vector<128x128xf32>
      %c0_87 = arith.constant 0 : index
      %c0_88 = arith.constant 0 : index
      %266 = vector.load %arg9[%c0_87, %c0_88] : memref<128x128xf32, #tpu.memory_space<vmem>>, vector<128x128xf32>
      tpu.vector_store %arg9[%c0_87, %c0_88], %265 {strides = array<i32>} : memref<128x128xf32, #tpu.memory_space<vmem>>, vector<128x128xf32>,
    } else {
    }
    %c0 = arith.constant 0 : index
    %c0_1 = arith.constant 0 : index
    %3 = vector.load %arg2[%c0, %c0_1] : memref<128x128xbf16, #tpu.memory_space<vmem>>, vector<128x128xbf16>
    %c0_2 = arith.constant 0 : index
    %c0_3 = arith.constant 0 : index
    %4 = vector.load %arg3[%c0_2, %c0_3] : memref<128x128xbf16, #tpu.memory_space<vmem>>, vector<128x128xbf16>
    %cst = arith.constant 0.000000e+00 : bf16
    %5 = vector.broadcast %cst : bf16 to vector<128x1xbf16>
    %6 = vector.extract_strided_slice %3 {offsets = [0, 0], sizes = [128, 127], strides = [1, 1]} : vector<128x128xbf16> to vector<128x127xbf16>
    %7 = tpu.concatenate %5, %6 in 1 : vector<128x1xbf16>, vector<128x127xbf16> -> vector<128x128xbf16>
    %8 = vector.extract_strided_slice %3 {offsets = [0, 1], sizes = [128, 127], strides = [1, 1]} : vector<128x128xbf16> to vector<128x127xbf16>
    %cst_4 = arith.constant 0.000000e+00 : bf16
    %9 = vector.broadcast %cst_4 : bf16 to vector<128x1xbf16>
    %10 = tpu.concatenate %8, %9 in 1 : vector<128x127xbf16>, vector<128x1xbf16> -> vector<128x128xbf16>
    %cst_5 = arith.constant 0.000000e+00 : bf16
    %11 = vector.broadcast %cst_5 : bf16 to vector<128x1xbf16>
    %12 = vector.extract_strided_slice %4 {offsets = [0, 0], sizes = [128, 127], strides = [1, 1]} : vector<128x128xbf16> to vector<128x127xbf16>
    %13 = tpu.concatenate %11, %12 in 1 : vector<128x1xbf16>, vector<128x127xbf16> -> vector<128x128xbf16>
    %14 = vector.extract_strided_slice %4 {offsets = [0, 1], sizes = [128, 127], strides = [1, 1]} : vector<128x128xbf16> to vector<128x127xbf16>
    %cst_6 = arith.constant 0.000000e+00 : bf16
    %15 = vector.broadcast %cst_6 : bf16 to vector<128x1xbf16>
    %16 = tpu.concatenate %14, %15 in 1 : vector<128x127xbf16>, vector<128x1xbf16> -> vector<128x128xbf16>
    %c4_i32 = arith.constant 4 : i32
    %17 = arith.muli %arg1, %c4_i32 : i32
    %c0_i32_7 = arith.constant 0 : i32
    %18 = arith.addi %17, %c0_i32_7 : i32
    %c6_i32 = arith.constant 6 : i32
    %19 = arith.muli %18, %c6_i32 : i32
    %cst_8 = arith.constant 0.000000e+00 : bf16
    %20 = vector.broadcast %cst_8 : bf16 to vector<128x128xbf16>
    %21 = arith.index_cast %18 : i32 to index
    %22 = memref.load %arg7[%21] : memref<4xf32, #tpu.memory_space<smem>>
    %23 = arith.truncf %22 : f32 to bf16
    %24 = vector.broadcast %23 : bf16 to vector<128x128xbf16>
    %25 = arith.addf %20, %24 : vector<128x128xbf16>
    %c0_i32_9 = arith.constant 0 : i32
    %26 = arith.addi %19, %c0_i32_9 : i32
    %27 = arith.index_cast %26 : i32 to index
    %28 = memref.load %arg6[%27] : memref<24xf32, #tpu.memory_space<smem>>
    %29 = arith.truncf %28 : f32 to bf16
    %c3_i32 = arith.constant 3 : i32
    %30 = arith.addi %19, %c3_i32 : i32
    %c0_i32_10 = arith.constant 0 : i32
    %31 = arith.addi %30, %c0_i32_10 : i32
    %32 = arith.index_cast %31 : i32 to index
    %33 = memref.load %arg6[%32] : memref<24xf32, #tpu.memory_space<smem>>
    %34 = arith.truncf %33 : f32 to bf16
    %35 = vector.broadcast %29 : bf16 to vector<128x128xbf16>
    %36 = arith.mulf %35, %7 : vector<128x128xbf16>
    %37 = arith.addf %25, %36 : vector<128x128xbf16>
    %38 = vector.broadcast %34 : bf16 to vector<128x128xbf16>
    %39 = arith.mulf %38, %13 : vector<128x128xbf16>
    %40 = arith.addf %37, %39 : vector<128x128xbf16>
    %c1_i32 = arith.constant 1 : i32
    %41 = arith.addi %19, %c1_i32 : i32
    %42 = arith.index_cast %41 : i32 to index
    %43 = memref.load %arg6[%42] : memref<24xf32, #tpu.memory_space<smem>>
    %44 = arith.truncf %43 : f32 to bf16
    %c3_i32_11 = arith.constant 3 : i32
    %45 = arith.addi %19, %c3_i32_11 : i32
    %c1_i32_12 = arith.constant 1 : i32
    %46 = arith.addi %45, %c1_i32_12 : i32
    %47 = arith.index_cast %46 : i32 to index
    %48 = memref.load %arg6[%47] : memref<24xf32, #tpu.memory_space<smem>>
    %49 = arith.truncf %48 : f32 to bf16
    %50 = vector.broadcast %44 : bf16 to vector<128x128xbf16>
    %51 = arith.mulf %50, %3 : vector<128x128xbf16>
    %52 = arith.addf %40, %51 : vector<128x128xbf16>
    %53 = vector.broadcast %49 : bf16 to vector<128x128xbf16>
    %54 = arith.mulf %53, %4 : vector<128x128xbf16>
    %55 = arith.addf %52, %54 : vector<128x128xbf16>
    %c2_i32 = arith.constant 2 : i32
    %56 = arith.addi %19, %c2_i32 : i32
    %57 = arith.index_cast %56 : i32 to index
    %58 = memref.load %arg6[%57] : memref<24xf32, #tpu.memory_space<smem>>
    %59 = arith.truncf %58 : f32 to bf16
    %c3_i32_13 = arith.constant 3 : i32
    %60 = arith.addi %19, %c3_i32_13 : i32
    %c2_i32_14 = arith.constant 2 : i32
    %61 = arith.addi %60, %c2_i32_14 : i32
    %62 = arith.index_cast %61 : i32 to index
    %63 = memref.load %arg6[%62] : memref<24xf32, #tpu.memory_space<smem>>
    %64 = arith.truncf %63 : f32 to bf16
    %65 = vector.broadcast %59 : bf16 to vector<128x128xbf16>
    %66 = arith.mulf %65, %10 : vector<128x128xbf16>
    %67 = arith.addf %55, %66 : vector<128x128xbf16>
    %68 = vector.broadcast %64 : bf16 to vector<128x128xbf16>
    %69 = arith.mulf %68, %16 : vector<128x128xbf16>
    %70 = arith.addf %67, %69 : vector<128x128xbf16>
    %cst_15 = arith.constant 0.000000e+00 : bf16
    %71 = vector.broadcast %cst_15 : bf16 to vector<128x128xbf16>
    %72 = arith.maximumf %70, %71 : vector<128x128xbf16>
    %c0_16 = arith.constant 0 : index
    %c0_17 = arith.constant 0 : index
    %73 = vector.load %arg9[%c0_16, %c0_17] : memref<128x128xf32, #tpu.memory_space<vmem>>, vector<128x128xf32>
    %c0_18 = arith.constant 0 : index
    %c0_19 = arith.constant 0 : index
    %c0_20 = arith.constant 0 : index
    %74 = vector.load %arg4[%c0_18, %c0_19, %c0_20] : memref<4x128x128xbf16, #tpu.memory_space<vmem>>, vector<1x128x128xbf16>
    %75 = vector.shape_cast %74 : vector<1x128x128xbf16> to vector<128x128xbf16>
    %cst_21 = arith.constant dense<0.000000e+00> : vector<128x128xf32>
    %76 = tpu.matmul %72, %75, %cst_21 {dimension_numbers = #tpu.dot_dimension_numbers<[1], [0], [0], [1], [0, 0, 1, 1], [], []>} : vector<128x128xbf16>, vector<128x128xbf16>, vector<128x128xf32> -> vector<128x128xf32>
    %77 = arith.addf %73, %76 : vector<128x128xf32>
    %c0_22 = arith.constant 0 : index
    %c0_23 = arith.constant 0 : index
    %78 = vector.load %arg9[%c0_22, %c0_23] : memref<128x128xf32, #tpu.memory_space<vmem>>, vector<128x128xf32>
    tpu.vector_store %arg9[%c0_22, %c0_23], %77 {strides = array<i32>} : memref<128x128xf32, #tpu.memory_space<vmem>>, vector<128x128xf32>,
    %c1_i32_24 = arith.constant 1 : i32
    %79 = arith.addi %17, %c1_i32_24 : i32
    %c6_i32_25 = arith.constant 6 : i32
    %80 = arith.muli %79, %c6_i32_25 : i32
    %cst_26 = arith.constant 0.000000e+00 : bf16
    %81 = vector.broadcast %cst_26 : bf16 to vector<128x128xbf16>
    %82 = arith.index_cast %79 : i32 to index
    %83 = memref.load %arg7[%82] : memref<4xf32, #tpu.memory_space<smem>>
    %84 = arith.truncf %83 : f32 to bf16
    %85 = vector.broadcast %84 : bf16 to vector<128x128xbf16>
    %86 = arith.addf %81, %85 : vector<128x128xbf16>
    %c0_i32_27 = arith.constant 0 : i32
    %87 = arith.addi %80, %c0_i32_27 : i32
    %88 = arith.index_cast %87 : i32 to index
    %89 = memref.load %arg6[%88] : memref<24xf32, #tpu.memory_space<smem>>
    %90 = arith.truncf %89 : f32 to bf16
    %c3_i32_28 = arith.constant 3 : i32
    %91 = arith.addi %80, %c3_i32_28 : i32
    %c0_i32_29 = arith.constant 0 : i32
    %92 = arith.addi %91, %c0_i32_29 : i32
    %93 = arith.index_cast %92 : i32 to index
    %94 = memref.load %arg6[%93] : memref<24xf32, #tpu.memory_space<smem>>
    %95 = arith.truncf %94 : f32 to bf16
    %96 = vector.broadcast %90 : bf16 to vector<128x128xbf16>
    %97 = arith.mulf %96, %7 : vector<128x128xbf16>
    %98 = arith.addf %86, %97 : vector<128x128xbf16>
    %99 = vector.broadcast %95 : bf16 to vector<128x128xbf16>
    %100 = arith.mulf %99, %13 : vector<128x128xbf16>
    %101 = arith.addf %98, %100 : vector<128x128xbf16>
    %c1_i32_30 = arith.constant 1 : i32
    %102 = arith.addi %80, %c1_i32_30 : i32
    %103 = arith.index_cast %102 : i32 to index
    %104 = memref.load %arg6[%103] : memref<24xf32, #tpu.memory_space<smem>>
    %105 = arith.truncf %104 : f32 to bf16
    %c3_i32_31 = arith.constant 3 : i32
    %106 = arith.addi %80, %c3_i32_31 : i32
    %c1_i32_32 = arith.constant 1 : i32
    %107 = arith.addi %106, %c1_i32_32 : i32
    %108 = arith.index_cast %107 : i32 to index
    %109 = memref.load %arg6[%108] : memref<24xf32, #tpu.memory_space<smem>>
    %110 = arith.truncf %109 : f32 to bf16
    %111 = vector.broadcast %105 : bf16 to vector<128x128xbf16>
    %112 = arith.mulf %111, %3 : vector<128x128xbf16>
    %113 = arith.addf %101, %112 : vector<128x128xbf16>
    %114 = vector.broadcast %110 : bf16 to vector<128x128xbf16>
    %115 = arith.mulf %114, %4 : vector<128x128xbf16>
    %116 = arith.addf %113, %115 : vector<128x128xbf16>
    %c2_i32_33 = arith.constant 2 : i32
    %117 = arith.addi %80, %c2_i32_33 : i32
    %118 = arith.index_cast %117 : i32 to index
    %119 = memref.load %arg6[%118] : memref<24xf32, #tpu.memory_space<smem>>
    %120 = arith.truncf %119 : f32 to bf16
    %c3_i32_34 = arith.constant 3 : i32
    %121 = arith.addi %80, %c3_i32_34 : i32
    %c2_i32_35 = arith.constant 2 : i32
    %122 = arith.addi %121, %c2_i32_35 : i32
    %123 = arith.index_cast %122 : i32 to index
    %124 = memref.load %arg6[%123] : memref<24xf32, #tpu.memory_space<smem>>
    %125 = arith.truncf %124 : f32 to bf16
    %126 = vector.broadcast %120 : bf16 to vector<128x128xbf16>
    %127 = arith.mulf %126, %10 : vector<128x128xbf16>
    %128 = arith.addf %116, %127 : vector<128x128xbf16>
    %129 = vector.broadcast %125 : bf16 to vector<128x128xbf16>
    %130 = arith.mulf %129, %16 : vector<128x128xbf16>
    %131 = arith.addf %128, %130 : vector<128x128xbf16>
    %cst_36 = arith.constant 0.000000e+00 : bf16
    %132 = vector.broadcast %cst_36 : bf16 to vector<128x128xbf16>
    %133 = arith.maximumf %131, %132 : vector<128x128xbf16>
    %c0_37 = arith.constant 0 : index
    %c0_38 = arith.constant 0 : index
    %134 = vector.load %arg9[%c0_37, %c0_38] : memref<128x128xf32, #tpu.memory_space<vmem>>, vector<128x128xf32>
    %c1 = arith.constant 1 : index
    %c0_39 = arith.constant 0 : index
    %c0_40 = arith.constant 0 : index
    %135 = vector.load %arg4[%c1, %c0_39, %c0_40] : memref<4x128x128xbf16, #tpu.memory_space<vmem>>, vector<1x128x128xbf16>
    %136 = vector.shape_cast %135 : vector<1x128x128xbf16> to vector<128x128xbf16>
    %cst_41 = arith.constant dense<0.000000e+00> : vector<128x128xf32>
    %137 = tpu.matmul %133, %136, %cst_41 {dimension_numbers = #tpu.dot_dimension_numbers<[1], [0], [0], [1], [0, 0, 1, 1], [], []>} : vector<128x128xbf16>, vector<128x128xbf16>, vector<128x128xf32> -> vector<128x128xf32>
    %138 = arith.addf %134, %137 : vector<128x128xf32>
    %c0_42 = arith.constant 0 : index
    %c0_43 = arith.constant 0 : index
    %139 = vector.load %arg9[%c0_42, %c0_43] : memref<128x128xf32, #tpu.memory_space<vmem>>, vector<128x128xf32>
    tpu.vector_store %arg9[%c0_42, %c0_43], %138 {strides = array<i32>} : memref<128x128xf32, #tpu.memory_space<vmem>>, vector<128x128xf32>,
    %c2_i32_44 = arith.constant 2 : i32
    %140 = arith.addi %17, %c2_i32_44 : i32
    %c6_i32_45 = arith.constant 6 : i32
    %141 = arith.muli %140, %c6_i32_45 : i32
    %cst_46 = arith.constant 0.000000e+00 : bf16
    %142 = vector.broadcast %cst_46 : bf16 to vector<128x128xbf16>
    %143 = arith.index_cast %140 : i32 to index
    %144 = memref.load %arg7[%143] : memref<4xf32, #tpu.memory_space<smem>>
    %145 = arith.truncf %144 : f32 to bf16
    %146 = vector.broadcast %145 : bf16 to vector<128x128xbf16>
    %147 = arith.addf %142, %146 : vector<128x128xbf16>
    %c0_i32_47 = arith.constant 0 : i32
    %148 = arith.addi %141, %c0_i32_47 : i32
    %149 = arith.index_cast %148 : i32 to index
    %150 = memref.load %arg6[%149] : memref<24xf32, #tpu.memory_space<smem>>
    %151 = arith.truncf %150 : f32 to bf16
    %c3_i32_48 = arith.constant 3 : i32
    %152 = arith.addi %141, %c3_i32_48 : i32
    %c0_i32_49 = arith.constant 0 : i32
    %153 = arith.addi %152, %c0_i32_49 : i32
    %154 = arith.index_cast %153 : i32 to index
    %155 = memref.load %arg6[%154] : memref<24xf32, #tpu.memory_space<smem>>
    %156 = arith.truncf %155 : f32 to bf16
    %157 = vector.broadcast %151 : bf16 to vector<128x128xbf16>
    %158 = arith.mulf %157, %7 : vector<128x128xbf16>
    %159 = arith.addf %147, %158 : vector<128x128xbf16>
    %160 = vector.broadcast %156 : bf16 to vector<128x128xbf16>
    %161 = arith.mulf %160, %13 : vector<128x128xbf16>
    %162 = arith.addf %159, %161 : vector<128x128xbf16>
    %c1_i32_50 = arith.constant 1 : i32
    %163 = arith.addi %141, %c1_i32_50 : i32
    %164 = arith.index_cast %163 : i32 to index
    %165 = memref.load %arg6[%164] : memref<24xf32, #tpu.memory_space<smem>>
    %166 = arith.truncf %165 : f32 to bf16
    %c3_i32_51 = arith.constant 3 : i32
    %167 = arith.addi %141, %c3_i32_51 : i32
    %c1_i32_52 = arith.constant 1 : i32
    %168 = arith.addi %167, %c1_i32_52 : i32
    %169 = arith.index_cast %168 : i32 to index
    %170 = memref.load %arg6[%169] : memref<24xf32, #tpu.memory_space<smem>>
    %171 = arith.truncf %170 : f32 to bf16
    %172 = vector.broadcast %166 : bf16 to vector<128x128xbf16>
    %173 = arith.mulf %172, %3 : vector<128x128xbf16>
    %174 = arith.addf %162, %173 : vector<128x128xbf16>
    %175 = vector.broadcast %171 : bf16 to vector<128x128xbf16>
    %176 = arith.mulf %175, %4 : vector<128x128xbf16>
    %177 = arith.addf %174, %176 : vector<128x128xbf16>
    %c2_i32_53 = arith.constant 2 : i32
    %178 = arith.addi %141, %c2_i32_53 : i32
    %179 = arith.index_cast %178 : i32 to index
    %180 = memref.load %arg6[%179] : memref<24xf32, #tpu.memory_space<smem>>
    %181 = arith.truncf %180 : f32 to bf16
    %c3_i32_54 = arith.constant 3 : i32
    %182 = arith.addi %141, %c3_i32_54 : i32
    %c2_i32_55 = arith.constant 2 : i32
    %183 = arith.addi %182, %c2_i32_55 : i32
    %184 = arith.index_cast %183 : i32 to index
    %185 = memref.load %arg6[%184] : memref<24xf32, #tpu.memory_space<smem>>
    %186 = arith.truncf %185 : f32 to bf16
    %187 = vector.broadcast %181 : bf16 to vector<128x128xbf16>
    %188 = arith.mulf %187, %10 : vector<128x128xbf16>
    %189 = arith.addf %177, %188 : vector<128x128xbf16>
    %190 = vector.broadcast %186 : bf16 to vector<128x128xbf16>
    %191 = arith.mulf %190, %16 : vector<128x128xbf16>
    %192 = arith.addf %189, %191 : vector<128x128xbf16>
    %cst_56 = arith.constant 0.000000e+00 : bf16
    %193 = vector.broadcast %cst_56 : bf16 to vector<128x128xbf16>
    %194 = arith.maximumf %192, %193 : vector<128x128xbf16>
    %c0_57 = arith.constant 0 : index
    %c0_58 = arith.constant 0 : index
    %195 = vector.load %arg9[%c0_57, %c0_58] : memref<128x128xf32, #tpu.memory_space<vmem>>, vector<128x128xf32>
    %c2 = arith.constant 2 : index
    %c0_59 = arith.constant 0 : index
    %c0_60 = arith.constant 0 : index
    %196 = vector.load %arg4[%c2, %c0_59, %c0_60] : memref<4x128x128xbf16, #tpu.memory_space<vmem>>, vector<1x128x128xbf16>
    %197 = vector.shape_cast %196 : vector<1x128x128xbf16> to vector<128x128xbf16>
    %cst_61 = arith.constant dense<0.000000e+00> : vector<128x128xf32>
    %198 = tpu.matmul %194, %197, %cst_61 {dimension_numbers = #tpu.dot_dimension_numbers<[1], [0], [0], [1], [0, 0, 1, 1], [], []>} : vector<128x128xbf16>, vector<128x128xbf16>, vector<128x128xf32> -> vector<128x128xf32>
    %199 = arith.addf %195, %198 : vector<128x128xf32>
    %c0_62 = arith.constant 0 : index
    %c0_63 = arith.constant 0 : index
    %200 = vector.load %arg9[%c0_62, %c0_63] : memref<128x128xf32, #tpu.memory_space<vmem>>, vector<128x128xf32>
    tpu.vector_store %arg9[%c0_62, %c0_63], %199 {strides = array<i32>} : memref<128x128xf32, #tpu.memory_space<vmem>>, vector<128x128xf32>,
    %c3_i32_64 = arith.constant 3 : i32
    %201 = arith.addi %17, %c3_i32_64 : i32
    %c6_i32_65 = arith.constant 6 : i32
    %202 = arith.muli %201, %c6_i32_65 : i32
    %cst_66 = arith.constant 0.000000e+00 : bf16
    %203 = vector.broadcast %cst_66 : bf16 to vector<128x128xbf16>
    %204 = arith.index_cast %201 : i32 to index
    %205 = memref.load %arg7[%204] : memref<4xf32, #tpu.memory_space<smem>>
    %206 = arith.truncf %205 : f32 to bf16
    %207 = vector.broadcast %206 : bf16 to vector<128x128xbf16>
    %208 = arith.addf %203, %207 : vector<128x128xbf16>
    %c0_i32_67 = arith.constant 0 : i32
    %209 = arith.addi %202, %c0_i32_67 : i32
    %210 = arith.index_cast %209 : i32 to index
    %211 = memref.load %arg6[%210] : memref<24xf32, #tpu.memory_space<smem>>
    %212 = arith.truncf %211 : f32 to bf16
    %c3_i32_68 = arith.constant 3 : i32
    %213 = arith.addi %202, %c3_i32_68 : i32
    %c0_i32_69 = arith.constant 0 : i32
    %214 = arith.addi %213, %c0_i32_69 : i32
    %215 = arith.index_cast %214 : i32 to index
    %216 = memref.load %arg6[%215] : memref<24xf32, #tpu.memory_space<smem>>
    %217 = arith.truncf %216 : f32 to bf16
    %218 = vector.broadcast %212 : bf16 to vector<128x128xbf16>
    %219 = arith.mulf %218, %7 : vector<128x128xbf16>
    %220 = arith.addf %208, %219 : vector<128x128xbf16>
    %221 = vector.broadcast %217 : bf16 to vector<128x128xbf16>
    %222 = arith.mulf %221, %13 : vector<128x128xbf16>
    %223 = arith.addf %220, %222 : vector<128x128xbf16>
    %c1_i32_70 = arith.constant 1 : i32
    %224 = arith.addi %202, %c1_i32_70 : i32
    %225 = arith.index_cast %224 : i32 to index
    %226 = memref.load %arg6[%225] : memref<24xf32, #tpu.memory_space<smem>>
    %227 = arith.truncf %226 : f32 to bf16
    %c3_i32_71 = arith.constant 3 : i32
    %228 = arith.addi %202, %c3_i32_71 : i32
    %c1_i32_72 = arith.constant 1 : i32
    %229 = arith.addi %228, %c1_i32_72 : i32
    %230 = arith.index_cast %229 : i32 to index
    %231 = memref.load %arg6[%230] : memref<24xf32, #tpu.memory_space<smem>>
    %232 = arith.truncf %231 : f32 to bf16
    %233 = vector.broadcast %227 : bf16 to vector<128x128xbf16>
    %234 = arith.mulf %233, %3 : vector<128x128xbf16>
    %235 = arith.addf %223, %234 : vector<128x128xbf16>
    %236 = vector.broadcast %232 : bf16 to vector<128x128xbf16>
    %237 = arith.mulf %236, %4 : vector<128x128xbf16>
    %238 = arith.addf %235, %237 : vector<128x128xbf16>
    %c2_i32_73 = arith.constant 2 : i32
    %239 = arith.addi %202, %c2_i32_73 : i32
    %240 = arith.index_cast %239 : i32 to index
    %241 = memref.load %arg6[%240] : memref<24xf32, #tpu.memory_space<smem>>
    %242 = arith.truncf %241 : f32 to bf16
    %c3_i32_74 = arith.constant 3 : i32
    %243 = arith.addi %202, %c3_i32_74 : i32
    %c2_i32_75 = arith.constant 2 : i32
    %244 = arith.addi %243, %c2_i32_75 : i32
    %245 = arith.index_cast %244 : i32 to index
    %246 = memref.load %arg6[%245] : memref<24xf32, #tpu.memory_space<smem>>
    %247 = arith.truncf %246 : f32 to bf16
    %248 = vector.broadcast %242 : bf16 to vector<128x128xbf16>
    %249 = arith.mulf %248, %10 : vector<128x128xbf16>
    %250 = arith.addf %238, %249 : vector<128x128xbf16>
    %251 = vector.broadcast %247 : bf16 to vector<128x128xbf16>
    %252 = arith.mulf %251, %16 : vector<128x128xbf16>
    %253 = arith.addf %250, %252 : vector<128x128xbf16>
    %cst_76 = arith.constant 0.000000e+00 : bf16
    %254 = vector.broadcast %cst_76 : bf16 to vector<128x128xbf16>
    %255 = arith.maximumf %253, %254 : vector<128x128xbf16>
    %c0_77 = arith.constant 0 : index
    %c0_78 = arith.constant 0 : index
    %256 = vector.load %arg9[%c0_77, %c0_78] : memref<128x128xf32, #tpu.memory_space<vmem>>, vector<128x128xf32>
    %c3 = arith.constant 3 : index
    %c0_79 = arith.constant 0 : index
    %c0_80 = arith.constant 0 : index
    %257 = vector.load %arg4[%c3, %c0_79, %c0_80] : memref<4x128x128xbf16, #tpu.memory_space<vmem>>, vector<1x128x128xbf16>
    %258 = vector.shape_cast %257 : vector<1x128x128xbf16> to vector<128x128xbf16>
    %cst_81 = arith.constant dense<0.000000e+00> : vector<128x128xf32>
    %259 = tpu.matmul %255, %258, %cst_81 {dimension_numbers = #tpu.dot_dimension_numbers<[1], [0], [0], [1], [0, 0, 1, 1], [], []>} : vector<128x128xbf16>, vector<128x128xbf16>, vector<128x128xf32> -> vector<128x128xf32>
    %260 = arith.addf %256, %259 : vector<128x128xf32>
    %c0_82 = arith.constant 0 : index
    %c0_83 = arith.constant 0 : index
    %261 = vector.load %arg9[%c0_82, %c0_83] : memref<128x128xf32, #tpu.memory_space<vmem>>, vector<128x128xf32>
    tpu.vector_store %arg9[%c0_82, %c0_83], %260 {strides = array<i32>} : memref<128x128xf32, #tpu.memory_space<vmem>>, vector<128x128xf32>,
    %c0_i32_84 = arith.constant 0 : i32
    %262 = arith.cmpi eq, %arg1, %c0_i32_84 : i32
    %263 = arith.extui %262 : i1 to i32
    %c0_i32_85 = arith.constant 0 : i32
    %264 = arith.cmpi ne, %263, %c0_i32_85 : i32
    scf.if %264 {
      %c0_86 = arith.constant 0 : index
      %c0_87 = arith.constant 0 : index
      %265 = vector.load %arg9[%c0_86, %c0_87] : memref<128x128xf32, #tpu.memory_space<vmem>>, vector<128x128xf32>
      %c0_88 = arith.constant 0 : index
      %c0_89 = arith.constant 0 : index
      %266 = vector.load %arg5[%c0_88, %c0_89] : memref<1x128xf32, #tpu.memory_space<vmem>>, vector<1x128xf32>
      %267 = vector.broadcast %266 : vector<1x128xf32> to vector<128x128xf32>
      %268 = arith.addf %265, %267 : vector<128x128xf32>
      %cst_90 = arith.constant 0.000000e+00 : f32
      %269 = vector.broadcast %cst_90 : f32 to vector<128x128xf32>
      %270 = arith.maximumf %268, %269 : vector<128x128xf32>
      %271 = arith.truncf %270 : vector<128x128xf32> to vector<128x128xbf16>
      %c0_91 = arith.constant 0 : index
      %c0_92 = arith.constant 0 : index
      %272 = vector.load %arg8[%c0_91, %c0_92] : memref<128x128xbf16, #tpu.memory_space<vmem>>, vector<128x128xbf16>
      tpu.vector_store %arg8[%c0_91, %c0_92], %271 {strides = array<i32>} : memref<128x128xbf16, #tpu.memory_space<vmem>>, vector<128x128xbf16>,
    } else {
    }
    return
  }
  func.func @transform_0(%arg0: i32, %arg1: i32) -> (i32, i32) {
    %c0_i32 = arith.constant 0 : i32
    %c0_i32_0 = arith.constant 0 : i32
    return %arg0, %c0_i32 : i32, i32
  }
  func.func @transform_1(%arg0: i32, %arg1: i32) -> (i32, i32) {
    %c0_i32 = arith.constant 0 : i32
    %c0_i32_0 = arith.constant 0 : i32
    return %arg0, %c0_i32 : i32, i32
  }
  func.func @transform_2(%arg0: i32, %arg1: i32) -> (i32, i32, i32) {
    %c0_i32 = arith.constant 0 : i32
    %c0_i32_0 = arith.constant 0 : i32
    %c0_i32_1 = arith.constant 0 : i32
    return %arg1, %c0_i32, %c0_i32_0 : i32, i32, i32
  }
  func.func @transform_3(%arg0: i32, %arg1: i32) -> (i32, i32) {
    %c0_i32 = arith.constant 0 : i32
    %c0_i32_0 = arith.constant 0 : i32
    %c0_i32_1 = arith.constant 0 : i32
    return %c0_i32, %c0_i32_0 : i32, i32
  }
  func.func @transform_4(%arg0: i32, %arg1: i32) -> i32 {
    %c0_i32 = arith.constant 0 : i32
    %c0_i32_0 = arith.constant 0 : i32
    return %c0_i32 : i32
  }
  func.func @transform_5(%arg0: i32, %arg1: i32) -> i32 {
    %c0_i32 = arith.constant 0 : i32
    %c0_i32_0 = arith.constant 0 : i32
    return %c0_i32 : i32
  }
  func.func @transform_6(%arg0: i32, %arg1: i32) -> (i32, i32) {
    %c0_i32 = arith.constant 0 : i32
    %c0_i32_0 = arith.constant 0 : i32
    return %arg0, %c0_i32 : i32, i32
  }
}

</mosaic_0001>

<bundles_post_ra>
// kernel: tpu_custom_call.1
= control target key start
LH: loop header
LB: loop body
LE: loop exit
PB: predicated region body
PF: predicated region fallthrough
CT: control target
= control target key end

     0   :  { %s4903_s0 = inlined_call_operand.hbm [shape: bf16[128,128], index: 0, kind: input, shape index: {}]   ;;  %s4904_s1 = inlined_call_operand.hbm [shape: bf16[128,128], index: 1, kind: input, shape index: {}]   ;;  %s4905_s2 = inlined_call_operand.hbm [shape: bf16[4,128,128], index: 2, kind: input, shape index: {}]   ;;  %s4906_s3 = inlined_call_operand.vmem [shape: f32[1,128], index: 3, kind: input, shape index: {}]   ;;  %s4907_s4 = inlined_call_operand.vmem [shape: f32[24], index: 4, kind: input, shape index: {}]   ;;  %s4908_s5 = inlined_call_operand.vmem [shape: f32[4], index: 5, kind: input, shape index: {}]   ;;  %s4909_s6 = inlined_call_operand.hbm [shape: bf16[128,128], index: 6, kind: output, shape index: {}]  }
   0x1   :  { %4976 = sst [smem:[#allocation60_spill]] %s4906_s3 }
   0x2   :  { %4977 = sst [smem:[#allocation61_spill]] %s4909_s6 }
   0x3   :  { %11 = vsyncpa [#allocation4], 0 }
   0x4   :  { %12 = vsyncpa [#allocation8], 0 }
   0x5   :  { %13 = vsyncpa [#allocation6], 0 }
   0x6   :  { %14 = vsyncpa [#allocation12], 0 }
   0x7   :  { %15 = vsyncpa [#allocation5], 0  ;;  %s3314_s21 = smov [#allocation7]   ;;  %s3315_s23 = smov [#allocation3]  }
   0x8   :  { %s33_s22 = sshll.u32 %s3314_s21, 4  ;;  %s21_s24 = sshll.u32 %s3315_s23, 4  ;;  %s34_s22 = int_to_ptr.vmem [resolvable:$true] %s33_s22  ;;  %s22_s24 = int_to_ptr.vmem [resolvable:$true] %s21_s24 }
   0x9   :  { %s3208_s25 = scalar_lea.vmem %s34_s22, 1024  ;;  %p3213_p1 = scmp.lt.s32.totalorder %s34_s22, %s34_s22 }
   0xa   :  { %p3209_p0 = scmp.ne.s32.totalorder %s34_s22, %s3208_s25  ;;  %p3214_p2 = scmp.lt.s32.totalorder %s3208_s25, %s3208_s25 }
   0xc   :  { %p3215_p3 = por %p3214_p2, %p3213_p1 }
   0xe   :  { %p3216_p4 = pnand %p3215_p3, %p3209_p0 }
  0x10   :  { %3219 = shalt.err (!%p3216_p4)
}
  0x11   :  { %s4910_s26 = smov 64   ;;  %s4911_s27 = smov 4  }
  0x12   :  { %39 = dma.hbm_to_vmem [thread:$0]  %s4904_s1, 1024, %s34_s22, [#allocation8], %s4910_s26, %s4910_s26, %s4911_s27  }
  0x13   :  { %s3228_s30 = scalar_lea.vmem %s22_s24, 1024  ;;  %p3233_p6 = scmp.lt.s32.totalorder %s22_s24, %s22_s24 }
  0x14   :  { %p3229_p5 = scmp.ne.s32.totalorder %s22_s24, %s3228_s30  ;;  %p3234_p7 = scmp.lt.s32.totalorder %s3228_s30, %s3228_s30 }
  0x16   :  { %p3235_p8 = por %p3234_p7, %p3233_p6 }
  0x18   :  { %p3236_p9 = pnand %p3235_p8, %p3229_p5 }
  0x1a   :  { %3239 = shalt.err (!%p3236_p9)
}
  0x1b   :  { %27 = dma.hbm_to_vmem [thread:$0]  %s4903_s0, 1024, %s22_s24, [#allocation4], %s4910_s26, %s4910_s26, %s4911_s27  }
  0x1c   :  { %s60_s11 = sshll.u32 %s4907_s4, 4  ;;  %s3318_s12 = smov [#allocation9]   ;;  %s61_s11 = int_to_ptr.vmem [resolvable:$true] %s60_s11 }
  0x1d   :  { %s45_s1 = sshll.u32 %s3318_s12, 4  ;;  %s46_s1 = int_to_ptr.vmem [resolvable:$true] %s45_s1 }
  0x1e   :  { %s3248_s13 = scalar_lea.vmem %s46_s1, 4096  ;;  %p3253_p11 = scmp.lt.s32.totalorder %s46_s1, %s46_s1 }
  0x1f   :  { %p3249_p10 = scmp.ne.s32.totalorder %s46_s1, %s3248_s13  ;;  %p3254_p12 = scmp.lt.s32.totalorder %s3248_s13, %s3248_s13 }
  0x21   :  { %p3255_p13 = por %p3254_p12, %p3253_p11 }
  0x23   :  { %p3256_p0 = pnand %p3255_p13, %p3249_p10 }
  0x25   :  { %3259 = shalt.err (!%p3256_p0)
}
  0x26   :  { %51 = dma.hbm_to_vmem [thread:$0]  %s4905_s2, 4096, %s46_s1, [#allocation8], %s4910_s26, %s4910_s26, %s4911_s27  }
  0x27   :  { %s3260_s15 = scalar_lea.vmem %s61_s11, 16  ;;  %p3265_p2 = scmp.lt.s32.totalorder %s61_s11, %s61_s11 }
  0x28   :  { %p3261_p1 = scmp.ne.s32.totalorder %s61_s11, %s3260_s15  ;;  %p3266_p3 = scmp.lt.s32.totalorder %s3260_s15, %s3260_s15 }
  0x2a   :  { %p3267_p4 = por %p3266_p3, %p3265_p2 }
  0x2c   :  { %p3268_p5 = pnand %p3267_p4, %p3261_p1 }
  0x2e   :  { %3271 = shalt.err (!%p3268_p5)
}
  0x2f   :  { %s3319_s4 = smov [#allocation10]   ;;  %s70_s18 = sshll.u32 %s4908_s5, 4  ;;  %s71_s18 = int_to_ptr.vmem [resolvable:$true] %s70_s18 }
  0x30   :  { %63 = dma.vmem_to_smem %s61_s11, 16, %s3319_s4, [#allocation6]  }
  0x31   :  { %s3272_s19 = scalar_lea.vmem %s71_s18, 16  ;;  %p3277_p7 = scmp.lt.s32.totalorder %s71_s18, %s71_s18 }
  0x32   :  { %p3273_p6 = scmp.ne.s32.totalorder %s71_s18, %s3272_s19  ;;  %p3278_p8 = scmp.lt.s32.totalorder %s3272_s19, %s3272_s19 }
  0x34   :  { %p3279_p9 = por %p3278_p8, %p3277_p7 }
  0x36   :  { %p3280_p10 = pnand %p3279_p9, %p3273_p6 }
  0x38   :  { %3283 = shalt.err (!%p3280_p10)
}
  0x39   :  { %s3320_s2 = smov [#allocation11]  }
  0x3a   :  { %73 = dma.vmem_to_smem %s71_s18, 16, %s3320_s2, [#allocation12]  }
  0x3b   :  { %3304 = dma.done.wait [#allocation4], 1024  }
  0x3c   :  { %3305 = vsyncadd [#allocation4], 4294966272 }
  0x3d   :  { %3306 = dma.done.wait [#allocation8], 5120  }
  0x3e   :  { %3307 = vsyncadd [#allocation8], 4294962176 }
  0x3f   :  { %3308 = dma.done.wait [#allocation6], 16  }
  0x40   :  { %3309 = vsyncadd [#allocation6], 4294967280 }
  0x41   :  { %3310 = dma.done.wait [#allocation12], 16  }
  0x42   :  { %3311 = vsyncadd [#allocation12], 4294967280 }
  0x43   :  { %89 = sfence }
  0x44   :  { %v3384_v0 = vld [vmem:[#allocation7] sm:$0xf]  ;;  %v3386_v1 = vld [vmem:[#allocation7 + $0x4] sm:$0xf]  ;;  %s3396_s5 = sld [smem:[#allocation10 + $0xd]]  ;;  %s3321_s21 = smov 1  }
  0x45   :  { %v3390_v2 = vcombine.low %v3384_v0, %v3386_v1  ;;  %v3392_v3 = vld [vmem:[#allocation3] sm:$0xf]  ;;  %v3394_v4 = vld [vmem:[#allocation3 + $0x4] sm:$0xf]  ;;  %s3400_s20 = sld [smem:[#allocation10 + $0x13]]  ;;  %v3136_v14 = vld [vmem:[#allocation9 + $0x38] sm:$0xff]  }
  0x46   :  { %v2699_v5 = vcombine.low %v3392_v3, %v3394_v4  ;;  %v3402_v6 = vld [vmem:[#allocation7 + $0x8] sm:$0xf]  ;;  %v3404_v7 = vld [vmem:[#allocation7 + $0xc] sm:$0xf]  ;;  %v3419_v12 = vld [vmem:[#allocation3 + $0x10] sm:$0xf]  ;;  %2981 = vmatprep.subr.bf16.mxu0 %v3136_v14 }
  0x47   :  { %306 = vrot.lane.b32.xlu1 %v3390_v2, %s3321_s21  ;;  %v3410_v8 = vcombine.low %v3402_v6, %v3404_v7  ;;  %v3412_v9 = vld [vmem:[#allocation3 + $0x8] sm:$0xf]  ;;  %v3414_v10 = vld [vmem:[#allocation3 + $0xc] sm:$0xf]  ;;  %v3421_v13 = vld [vmem:[#allocation3 + $0x14] sm:$0xf]  ;;  %2982 = vmatpush3.bf16.msra.mxu0 %v3136_v14 }
  0x48   :  { %183 = vrot.lane.b32.xlu0 %v2699_v5, %s3321_s21  ;;  %v2700_v11 = vcombine.low %v3412_v9, %v3414_v10  ;;  %v3431_v15 = vcombine.low %v3419_v12, %v3421_v13  ;;  %v3137_v16 = vld [vmem:[#allocation9 + $0x78] sm:$0xff]   ;;  %v3138_v19 = vld [vmem:[#allocation9 + $0x30] sm:$0xff]   ;;  %s3322_s8 = smov 127   ;;  %v3140_v27 = vld [vmem:[#allocation9 + $0x28] sm:$0xff]   ;;  %s3469_s1 = sld [smem:[#allocation10 + $0x3]]  ;;  %vm199_vm0 = vcmask 7168  }
  0x49   :  { %v3434_v17 = vld [vmem:[#allocation3 + $0x18] sm:$0xf]  ;;  %v3436_v18 = vld [vmem:[#allocation3 + $0x1c] sm:$0xf]  ;;  %3013 = vmatprep.subr.bf16.mxu1 %v3137_v16  ;;  %2983 = vmatprep.subr.bf16.mxu0 %v3138_v19  ;;  %v3139_v21 = vld [vmem:[#allocation9 + $0x70] sm:$0xff]   ;;  %s3478_s14 = sld [smem:[#allocation10 + $0x9]] }
  0x4a   :  { %s1548_s22 = sshrl.u32 %s3396_s5, 16  ;;  %p1547_p11 = scmp.ne.f32.partialorder %s3396_s5, %s3396_s5  ;;  %3014 = vmatpush3.bf16.msra.mxu1 %v3137_v16  ;;  %v3449_v20 = vcombine.low %v3434_v17, %v3436_v18  ;;  %v131_v22 = vld [vmem:[#allocation7 + $0x10] sm:$0xf]  ;;  %v132_v23 = vld [vmem:[#allocation7 + $0x14] sm:$0xf]  ;;  %v3141_v30 = vld [vmem:[#allocation9 + $0x68] sm:$0xff]  }
  0x4b   :  { %308 = vrot.lane.b32.xlu1 %v3410_v8, %s3321_s21  ;;  %s1549_s23 = sand.u32 1, %s1548_s22  ;;  %s2087_s25 = sshrl.u32 %s3400_s20, 16  ;;  %3015 = vmatprep.subr.bf16.mxu1 %v3139_v21  ;;  %v133_v24 = vld [vmem:[#allocation7 + $0x18] sm:$0xf]  ;;  %v134_v25 = vld [vmem:[#allocation7 + $0x1c] sm:$0xf]  ;;  %v3462_v26 = vcombine.low %v131_v22, %v132_v23 }
  0x4c   :  { %185 = vrot.lane.b32.xlu0 %v2700_v11, %s3321_s21  ;;  %s1550_s24 = sadd.s32 32767, %s1549_s23  ;;  %s2088_s29 = sand.u32 1, %s2087_s25  ;;  %2984 = vmatpush3.bf16.msra.mxu0 %v3138_v19  ;;  %v3474_v28 = vld [vmem:[#allocation3 + $0x20] sm:$0xf]  ;;  %v3476_v29 = vld [vmem:[#allocation3 + $0x24] sm:$0xf]  ;;  %v3482_v31 = vcombine.low %v133_v24, %v134_v25 }
  0x4d   :  { %s1551_s28 = sadd.s32 %s3396_s5, %s1550_s24  ;;  %s2089_s7 = sadd.s32 32767, %s2088_s29  ;;  %2985 = vmatprep.subr.bf16.mxu0 %v3140_v27  ;;  %v3142_v32 = vld [vmem:[#allocation9 + $0x20] sm:$0xff]   ;;  %v3497_v34 = vld [vmem:[#allocation3 + $0x28] sm:$0xf]  ;;  %v3499_v35 = vld [vmem:[#allocation3 + $0x2c] sm:$0xf]  ;;  %v3509_v38 = vcombine.low %v3474_v28, %v3476_v29 }
  0x4e   :  { %s1552_s30 = sand.u32 4294901760, %s1551_s28  ;;  %p2086_p12 = scmp.ne.f32.partialorder %s3400_s20, %s3400_s20  ;;  %3016 = vmatpush3.bf16.msra.mxu1 %v3139_v21  ;;  %v3143_v33 = vld [vmem:[#allocation9 + $0x60] sm:$0xff]   ;;  %v3144_v36 = vld [vmem:[#allocation9 + $0x18] sm:$0xff]   ;;  %v3526_v41 = vcombine.low %v3497_v34, %v3499_v35  ;;  %v3536_v42 = vld [vmem:[#allocation7 + $0x28] sm:$0xf]  ;;  %vm241_vm1 = vcmask 1039360  }
  0x4f   :  { %225 = vrot.lane.b32.xlu1 %v2699_v5, %s3322_s8  ;;  %s5108_s30 = smov (%p1547_p11, %s1552_s30), 2143289344  ;;  %s2090_s9 = sadd.s32 %s3400_s20, %s2089_s7  ;;  %3017 = vmatprep.subr.bf16.mxu1 %v3141_v30  ;;  %v3145_v37 = vld [vmem:[#allocation9 + $0x58] sm:$0xff]   ;;  %v3517_v39 = vld [vmem:[#allocation7 + $0x20] sm:$0xf]  ;;  %v3519_v40 = vld [vmem:[#allocation7 + $0x24] sm:$0xf] }
  0x50   :  { %187 = vrot.lane.b32.xlu0 %v3431_v15, %s3321_s21  ;;  %s1555_s10 = sshrl.u32 %s5108_s30, 16  ;;  %s2091_s11 = sand.u32 4294901760, %s2090_s9  ;;  %2986 = vmatpush3.bf16.msra.mxu0 %v3140_v27  ;;  %4978 = vst [vmem:[#allocation19_spill] sm:$0xff] %v3536_v42  ;;  %v3538_v43 = vld [vmem:[#allocation7 + $0x2c] sm:$0xf]  ;;  %v3544_v44 = vcombine.low %v3517_v39, %v3519_v40  ;;  %v3146_v48 = vld [vmem:[#allocation9 + $0x10] sm:$0xff]  }
  0x51   :  { %s3457_s12 = sshll.u32 %s1555_s10, 16  ;;  %s5110_s11 = smov (%p2086_p12, %s2091_s11), 2143289344  ;;  %2987 = vmatprep.subr.bf16.mxu0 %v3142_v32  ;;  %4979 = vst [vmem:[#allocation20_spill] sm:$0xff] %v3538_v43  ;;  %v3554_v45 = vld [vmem:[#allocation3 + $0x30] sm:$0xf]  ;;  %v3564_v47 = vcombine.low %v3536_v42, %v3538_v43  ;;  %v3148_v53 = vld [vmem:[#allocation9 + $0x8] sm:$0xff]  }
  0x52   :  { %s2094_s13 = sshrl.u32 %s5110_s11, 16  ;;  %s3484_s15 = sld [smem:[#allocation10 + $0xf]]  ;;  %3018 = vmatpush3.bf16.msra.mxu1 %v3141_v30  ;;  %v3556_v46 = vld [vmem:[#allocation3 + $0x34] sm:$0xf]  ;;  %v3572_v50 = vld [vmem:[#allocation3 + $0x38] sm:$0xf] }
  0x53   :  { %227 = vrot.lane.b32.xlu1 %v2700_v11, %s3322_s8  ;;  %s2107_s0 = sshll.u32 %s2094_s13, 16  ;;  %s3486_s4 = sld [smem:[#allocation10 + $0x15]]  ;;  %3019 = vmatprep.subr.bf16.mxu1 %v3143_v33  ;;  %v3147_v49 = vld [vmem:[#allocation9 + $0x50] sm:$0xff]   ;;  %v3574_v51 = vld [vmem:[#allocation3 + $0x3c] sm:$0xf]  ;;  %v3583_v52 = vcombine.low %v3554_v45, %v3556_v46  ;;  %v3149_v54 = vld [vmem:[#allocation9 + $0x48] sm:$0xff]  }
  0x54   :  { %189 = vrot.lane.b32.xlu0 %v3449_v20, %s3321_s21  ;;  %s3488_s16 = sld [smem:[#allocation11]]  ;;  %s3493_s17 = sor.u32 %s3457_s12, %s1555_s10  ;;  %2988 = vmatpush3.bf16.msra.mxu0 %v3142_v32  ;;  %v139_v55 = vld [vmem:[#allocation7 + $0x30] sm:$0xf]  ;;  %v140_v56 = vld [vmem:[#allocation7 + $0x34] sm:$0xf]  ;;  %v2706_v57 = vcombine.low %v3572_v50, %v3574_v51  ;;  %v3150_v62 = vld [vmem:[#allocation9] sm:$0xff]  }
  0x55   :  { %s3501_s18 = sld [smem:[#allocation10]]  ;;  %s3503_s19 = sor.u32 %s2107_s0, %s2094_s13  ;;  %2989 = vmatprep.subr.bf16.mxu0 %v3144_v36  ;;  %v2713_v58 = vcombine.low %v139_v55, %v140_v56  ;;  %v141_v59 = vld [vmem:[#allocation7 + $0x38] sm:$0xf]  ;;  %v142_v60 = vld [vmem:[#allocation7 + $0x3c] sm:$0xf]  ;;  %v3151_v63 = vld [vmem:[#allocation9 + $0x40] sm:$0xff]  }
  0x56   :  { %s419_s2 = sshrl.u32 %s3469_s1, 16  ;;  %p418_p13 = scmp.ne.f32.partialorder %s3469_s1, %s3469_s1  ;;  %3020 = vmatpush3.bf16.msra.mxu1 %v3143_v33  ;;  %v2714_v61 = vcombine.low %v141_v59, %v142_v60  ;;  %v3683_v5 = vld [vmem:[#allocation9 + $0xf8] sm:$0xff]  }
  0x57   :  { %346 = vrot.lane.b32.xlu1 %v3390_v2, %s3322_s8  ;;  %s420_s5 = sand.u32 1, %s419_s2  ;;  %s957_s22 = sshrl.u32 %s3478_s14, 16  ;;  %3021 = vmatprep.subr.bf16.mxu1 %v3145_v37  ;;  %v3673_v2 = vld [vmem:[#allocation9 + $0xb8] sm:$0xff]   ;;  %4982 = vst [vmem:[#allocation23_spill] sm:$0xff] %v3683_v5 }
  0x58   :  { %310 = vrot.lane.b32.xlu0 %v3462_v26, %s3321_s21  ;;  %s421_s20 = sadd.s32 32767, %s420_s5  ;;  %s958_s24 = sand.u32 1, %s957_s22  ;;  %2990 = vmatpush3.bf16.msra.mxu0 %v3144_v36 }
  0x59   :  { %s422_s23 = sadd.s32 %s3469_s1, %s421_s20  ;;  %s959_s28 = sadd.s32 32767, %s958_s24  ;;  %2991 = vmatprep.subr.bf16.mxu0 %v3146_v48 }
  0x5a   :  { %s423_s25 = sand.u32 4294901760, %s422_s23  ;;  %p956_p0 = scmp.ne.f32.partialorder %s3478_s14, %s3478_s14  ;;  %3022 = vmatpush3.bf16.msra.mxu1 %v3145_v37 }
  0x5b   :  { %348 = vrot.lane.b32.xlu1 %v3410_v8, %s3322_s8  ;;  %s5112_s25 = smov (%p418_p13, %s423_s25), 2143289344  ;;  %s960_s29 = sadd.s32 %s3478_s14, %s959_s28  ;;  %3023 = vmatprep.subr.bf16.mxu1 %v3147_v49  ;;  %v3705_v8 = vstv %s3493_s17 }
  0x5c   :  { %312 = vrot.lane.b32.xlu0 %v3482_v31, %s3321_s21  ;;  %s426_s30 = sshrl.u32 %s5112_s25, 16  ;;  %s961_s7 = sand.u32 4294901760, %s960_s29  ;;  %2992 = vmatpush3.bf16.msra.mxu0 %v3146_v48  ;;  %v1572_v25 = vmul.bf16 %v3705_v8, %v3392_v3  ;;  %v1574_v59 = vmul.bf16 %v3705_v8, %v3412_v9  ;;  %v1575_v60 = vmul.bf16 %v3705_v8, %v3414_v10 }
  0x5d   :  { %s447_s9 = sshll.u32 %s426_s30, 16  ;;  %s1496_s10 = sshrl.u32 %s3484_s15, 16  ;;  %2993 = vmatprep.subr.bf16.mxu0 %v3148_v53 }
  0x5e   :  { %p1495_p1 = scmp.ne.f32.partialorder %s3484_s15, %s3484_s15  ;;  %s1497_s11 = sand.u32 1, %s1496_s10  ;;  %3024 = vmatpush3.bf16.msra.mxu1 %v3147_v49 }
  0x5f   :  { %229 = vrot.lane.b32.xlu1 %v3431_v15, %s3322_s8  ;;  %s5114_s7 = smov (%p956_p0, %s961_s7), 2143289344  ;;  %s3558_s12 = sor.u32 %s447_s9, %s426_s30  ;;  %3025 = vmatprep.subr.bf16.mxu1 %v3149_v54  ;;  %v3711_v15 = vstv %s3503_s19 }
  0x60   :  { %191 = vrot.lane.b32.xlu0 %v3509_v38, %s3321_s21  ;;  %s1498_s1 = sadd.s32 32767, %s1497_s11  ;;  %s964_s13 = sshrl.u32 %s5114_s7, 16  ;;  %2994 = vmatpush3.bf16.msra.mxu0 %v3148_v53  ;;  %v2111_v32 = vmul.bf16 %v3711_v15, %v3392_v3  ;;  %v2112_v33 = vmul.bf16 %v3711_v15, %v3394_v4 }
  0x61   :  { %s1499_s14 = sadd.s32 %s3484_s15, %s1498_s1  ;;  %s985_s0 = sshll.u32 %s964_s13, 16  ;;  %2995 = vmatprep.subr.bf16.mxu0 %v3150_v62 }
  0x62   :  { %s1500_s2 = sand.u32 4294901760, %s1499_s14  ;;  %p2034_p2 = scmp.ne.f32.partialorder %s3486_s4, %s3486_s4  ;;  %3026 = vmatpush3.bf16.msra.mxu1 %v3149_v54  ;;  %v2811_v55 = vcombine.low %v2111_v32, %v2112_v33  ;;  %v2113_v33 = vmul.bf16 %v3711_v15, %v3412_v9 }
  0x63   :  { %231 = vrot.lane.b32.xlu1 %v3449_v20, %s3322_s8  ;;  %s2035_s5 = sshrl.u32 %s3486_s4, 16  ;;  %s5116_s2 = smov (%p1495_p1, %s1500_s2), 2143289344  ;;  %3027 = vmatprep.subr.bf16.mxu1 %v3151_v63 }
  0x64   :  { %193 = vrot.lane.b32.xlu0 %v3526_v41, %s3321_s21  ;;  %s3585_s20 = sor.u32 %s985_s0, %s964_s13  ;;  %s2036_s22 = sand.u32 1, %s2035_s5  ;;  %2996 = vmatpush3.bf16.msra.mxu0 %v3150_v62 }
  0x65   :  { %s1503_s23 = sshrl.u32 %s5116_s2, 16  ;;  %s2037_s24 = sadd.s32 32767, %s2036_s22  ;;  %3045 = vmatprep.subr.bf16.mxu0 %v3673_v2 }
  0x66   :  { %s1524_s15 = sshll.u32 %s1503_s23, 16  ;;  %s2038_s25 = sadd.s32 %s3486_s4, %s2037_s24  ;;  %3028 = vmatpush3.bf16.msra.mxu1 %v3151_v63 }
  0x67   :  { %350 = vrot.lane.b32.xlu1 %v3462_v26, %s3322_s8  ;;  %s2039_s28 = sand.u32 4294901760, %s2038_s25  ;;  %p390_p3 = scmp.ne.f32.partialorder %s3488_s16, %s3488_s16  ;;  %3077 = vmatprep.subr.bf16.mxu1 %v3683_v5 }
  0x68   :  { %314 = vrot.lane.b32.xlu0 %v3544_v44, %s3321_s21  ;;  %s5118_s28 = smov (%p2034_p2, %s2039_s28), 2143289344  ;;  %s3601_s29 = sor.u32 %s1524_s15, %s1503_s23 }
  0x69   :  { %s391_s30 = sshrl.u32 %s3488_s16, 16  ;;  %s2042_s7 = sshrl.u32 %s5118_s28, 16  ;;  %v3714_v16 = vstv %s3601_s29 }
  0x6a   :  { %s392_s9 = sand.u32 1, %s391_s30  ;;  %p406_p4 = scmp.ne.f32.partialorder %s3501_s18, %s3501_s18  ;;  %4983 = vst [vmem:[#allocation24_spill] sm:$0xff] %v3714_v16 }
  0x6b   :  { %352 = vrot.lane.b32.xlu1 %v3482_v31, %s3322_s8  ;;  %s393_s4 = sadd.s32 32767, %s392_s9  ;;  %s2063_s10 = sshll.u32 %s2042_s7, 16  ;;  %v1573_v31 = vmul.bf16 %v3705_v8, %v3394_v4 }
  0x6c   :  { %316 = vrot.lane.b32.xlu0 %v3564_v47, %s3321_s21  ;;  %s394_s11 = sadd.s32 %s393_s4, %s3488_s16  ;;  %s407_s13 = sshrl.u32 %s3501_s18, 16 }
  0x6d   :  { %s395_s1 = sand.u32 4294901760, %s394_s11  ;;  %s408_s14 = sand.u32 1, %s407_s13  ;;  %v2780_v54 = vcombine.low %v1572_v25, %v1573_v31 }
  0x6e   :  { %s5120_s1 = smov (%p390_p3, %s395_s1), 2143289344  ;;  %s3617_s0 = sld [smem:[#allocation11 + $0x1]] }
  0x6f   :  { %233 = vrot.lane.b32.xlu1 %v3509_v38, %s3322_s8  ;;  %s398_s2 = sshrl.u32 %s5120_s1, 16  ;;  %s409_s5 = sadd.s32 32767, %s408_s14 }
  0x70   :  { %195 = vrot.lane.b32.xlu0 %v3583_v52, %s3321_s21  ;;  %s399_s22 = sshll.u32 %s398_s2, 16  ;;  %s410_s23 = sadd.s32 %s409_s5, %s3501_s18 }
  0x71   :  { %s3621_s24 = sor.u32 %s2063_s10, %s2042_s7  ;;  %s411_s16 = sand.u32 4294901760, %s410_s23 }
  0x72   :  { %s5122_s16 = smov (%p406_p4, %s411_s16), 2143289344  ;;  %s3629_s15 = sor.u32 %s399_s22, %s398_s2  ;;  %v3720_v20 = vstv %s3621_s24 }
  0x73   :  { %235 = vrot.lane.b32.xlu1 %v3526_v41, %s3322_s8  ;;  %s3631_s25 = sld [smem:[#allocation10 + $0x6]]  ;;  %s414_s28 = sshrl.u32 %s5122_s16, 16 }
  0x74   :  { %197 = vrot.lane.b32.xlu0 %v2706_v57, %s3321_s21  ;;  %p928_p5 = scmp.ne.f32.partialorder %s3617_s0, %s3617_s0  ;;  %s427_s30 = sshll.u32 %s414_s28, 16 }
  0x75   :  { %s929_s18 = sshrl.u32 %s3617_s0, 16  ;;  %s3641_s4 = sld [smem:[#allocation11 + $0x2]] }
  0x76   :  { %s930_s7 = sand.u32 1, %s929_s18  ;;  %s3644_s11 = sld [smem:[#allocation10 + $0xc]] }
  0x77   :  { %354 = vrot.lane.b32.xlu1 %v3544_v44, %s3322_s8  ;;  %s931_s9 = sadd.s32 32767, %s930_s7  ;;  %s3654_s14 = sld [smem:[#allocation11 + $0x3]] }
  0x78   :  { %318 = vrot.lane.b32.xlu0 %v2713_v58, %s3321_s21  ;;  %s932_s10 = sadd.s32 %s3617_s0, %s931_s9 }
  0x79   :  { %s933_s1 = sand.u32 4294901760, %s932_s10  ;;  %p944_p6 = scmp.ne.f32.partialorder %s3631_s25, %s3631_s25 }
  0x7a   :  { %s5124_s1 = smov (%p928_p5, %s933_s1), 2143289344  ;;  %s945_s13 = sshrl.u32 %s3631_s25, 16 }
  0x7b   :  { %356 = vrot.lane.b32.xlu1 %v3564_v47, %s3322_s8  ;;  %s936_s2 = sshrl.u32 %s5124_s1, 16  ;;  %s946_s5 = sand.u32 1, %s945_s13 }
  0x7c   :  { %320 = vrot.lane.b32.xlu0 %v2714_v61, %s3321_s21  ;;  %s3637_s21 = sor.u32 %s427_s30, %s414_s28  ;;  %s937_s22 = sshll.u32 %s936_s2, 16 }
  0x7d   :  { %s947_s23 = sadd.s32 32767, %s946_s5  ;;  %s3656_s16 = sor.u32 %s937_s22, %s936_s2 }
  0x7e   :  { %4980 = sst [smem:[#allocation21_spill]] %s3656_s16  ;;  %s948_s28 = sadd.s32 %s3631_s25, %s947_s23 }
  0x7f   :  { %239 = vrot.lane.b32.xlu1 %v2706_v57, %s3322_s8  ;;  %s949_s30 = sand.u32 4294901760, %s948_s28  ;;  %p1467_p7 = scmp.ne.f32.partialorder %s3641_s4, %s3641_s4 }
  0x80   :  { %237 = vrot.lane.b32.xlu0 %v3583_v52, %s3322_s8  ;;  %s5126_s30 = smov (%p944_p6, %s949_s30), 2143289344  ;;  %s1468_s0 = sshrl.u32 %s3641_s4, 16 }
  0x81   :  { %p1483_p8 = scmp.ne.f32.partialorder %s3644_s11, %s3644_s11  ;;  %s1469_s18 = sand.u32 1, %s1468_s0 }
  0x82   :  { %s1470_s9 = sadd.s32 32767, %s1469_s18  ;;  %s1484_s2 = sshrl.u32 %s3644_s11, 16 }
  0x83   :  { %360 = vrot.lane.b32.xlu1 %v2714_v61, %s3322_s8  ;;  %s1471_s1 = sadd.s32 %s3641_s4, %s1470_s9  ;;  %s1485_s5 = sand.u32 1, %s1484_s2 }
  0x84   :  { %358 = vrot.lane.b32.xlu0 %v2713_v58, %s3322_s8  ;;  %s952_s8 = sshrl.u32 %s5126_s30, 16  ;;  %s1472_s13 = sand.u32 4294901760, %s1471_s1 }
  0x85   :  { %s965_s7 = sshll.u32 %s952_s8, 16  ;;  %s5128_s13 = smov (%p1467_p7, %s1472_s13), 2143289344 }
  0x86   :  { %s3667_s10 = sor.u32 %s965_s7, %s952_s8  ;;  %p2006_p9 = scmp.ne.f32.partialorder %s3654_s14, %s3654_s14 }
  0x87   :  { %4981 = sst [smem:[#allocation22_spill]] %s3667_s10  ;;  %s1475_s25 = sshrl.u32 %s5128_s13, 16 }
  0x88   :  { %s1486_s22 = sadd.s32 32767, %s1485_s5  ;;  %s1476_s23 = sshll.u32 %s1475_s25, 16 }
  0x89   :  { %s1487_s28 = sadd.s32 %s3644_s11, %s1486_s22  ;;  %s3677_s30 = sor.u32 %s1476_s23, %s1475_s25 }
  0x8a   :  { %s1488_s4 = sand.u32 4294901760, %s1487_s28  ;;  %s2007_s0 = sshrl.u32 %s3654_s14, 16  ;;  %v1478_v11 = vstv %s3677_s30 }
  0x8b   :  { %s5130_s4 = smov (%p1483_p8, %s1488_s4), 2143289344  ;;  %s2807_s8 = sld [smem:[#allocation10 + $0x12]]  ;;  %v3733_v26 = vadd.bf16 0, %v1478_v11 }
  0x8c   :  { %s1491_s18 = sshrl.u32 %s5130_s4, 16  ;;  %s2008_s7 = sand.u32 1, %s2007_s0 }
  0x8d   :  { %s1504_s9 = sshll.u32 %s1491_s18, 16  ;;  %s2009_s1 = sadd.s32 32767, %s2008_s7  ;;  %4986 = vst [vmem:[#allocation27_spill] sm:$0xff] %v3733_v26 }
  0x8e   :  { %s3685_s13 = sor.u32 %s1504_s9, %s1491_s18  ;;  %s2010_s2 = sadd.s32 %s3654_s14, %s2009_s1 }
  0x8f   :  { %s2011_s5 = sand.u32 4294901760, %s2010_s2  ;;  %s2734_s22 = sld [smem:[#allocation10 + $0x2]]  ;;  %v3726_v22 = vstv %s3685_s13 }
  0x90   :  { %s5132_s5 = smov (%p2006_p9, %s2011_s5), 2143289344  ;;  %s2765_s7 = sld [smem:[#allocation10 + $0x8]]  ;;  %4984 = vst [vmem:[#allocation25_spill] sm:$0xff] %v3726_v22 }
  0x91   :  { %p2022_p10 = scmp.ne.f32.partialorder %s2807_s8, %s2807_s8  ;;  %s2023_s11 = sshrl.u32 %s2807_s8, 16 }
  0x92   :  { %s2014_s25 = sshrl.u32 %s5132_s5, 16  ;;  %s2024_s23 = sand.u32 1, %s2023_s11 }
  0x93   :  { %s2015_s28 = sshll.u32 %s2014_s25, 16  ;;  %s2025_s4 = sadd.s32 32767, %s2024_s23 }
  0x94   :  { %s3692_s0 = sor.u32 %s2015_s28, %s2014_s25  ;;  %s2026_s26 = sadd.s32 %s2807_s8, %s2025_s4 }
  0x95   :  { %s2027_s27 = sand.u32 4294901760, %s2026_s26  ;;  %p646_p11 = scmp.ne.f32.partialorder %s2734_s22, %s2734_s22  ;;  %v2017_v14 = vstv %s3692_s0 }
  0x96   :  { %s5134_s27 = smov (%p2022_p10, %s2027_s27), 2143289344  ;;  %s647_s18 = sshrl.u32 %s2734_s22, 16  ;;  %v3735_v27 = vadd.bf16 0, %v2017_v14 }
  0x97   :  { %s2030_s9 = sshrl.u32 %s5134_s27, 16  ;;  %s648_s1 = sand.u32 1, %s647_s18 }
  0x98   :  { %s2043_s2 = sshll.u32 %s2030_s9, 16  ;;  %s649_s6 = sadd.s32 32767, %s648_s1  ;;  %4987 = vst [vmem:[#allocation28_spill] sm:$0xff] %v3735_v27 }
  0x99   :  { %s3694_s14 = sor.u32 %s2043_s2, %s2030_s9  ;;  %s650_s3 = sadd.s32 %s2734_s22, %s649_s6 }
  0x9a   :  { %s651_s10 = sand.u32 4294901760, %s650_s3  ;;  %s2779_s5 = sld [smem:[#allocation10 + $0x10]]  ;;  %v3729_v23 = vstv %s3694_s14 }
  0x9b   :  { %s5136_s10 = smov (%p646_p11, %s651_s10), 2143289344  ;;  %p1184_p12 = scmp.ne.f32.partialorder %s2765_s7, %s2765_s7  ;;  %4985 = vst [vmem:[#allocation26_spill] sm:$0xff] %v3729_v23 }
  0x9c   :  { %s1185_s11 = sshrl.u32 %s2765_s7, 16  ;;  %s654_s25 = sshrl.u32 %s5136_s10, 16 }
  0x9d   :  { %s1186_s23 = sand.u32 1, %s1185_s11  ;;  %s667_s8 = sshll.u32 %s654_s25, 16 }
  0x9e   :  { %s1187_s26 = sadd.s32 32767, %s1186_s23  ;;  %s3696_s28 = sor.u32 %s667_s8, %s654_s25 }
  0x9f   :  { %s1188_s4 = sadd.s32 %s2765_s7, %s1187_s26  ;;  %s2796_s18 = sld [smem:[#allocation10 + $0xe]] }
  0xa0   :  { %s1189_s16 = sand.u32 4294901760, %s1188_s4  ;;  %p1559_p13 = scmp.ne.f32.partialorder %s2779_s5, %s2779_s5 }
  0xa1   :  { %s5138_s16 = smov (%p1184_p12, %s1189_s16), 2143289344  ;;  %s1560_s27 = sshrl.u32 %s2779_s5, 16 }
  0xa2   :  { %s1192_s9 = sshrl.u32 %s5138_s16, 16  ;;  %s1561_s1 = sand.u32 1, %s1560_s27 }
  0xa3   :  { %s1205_s6 = sshll.u32 %s1192_s9, 16  ;;  %s1562_s3 = sadd.s32 32767, %s1561_s1 }
  0xa4   :  { %s3698_s22 = sor.u32 %s1205_s6, %s1192_s9  ;;  %s1563_s2 = sadd.s32 %s2779_s5, %s1562_s3 }
  0xa5   :  { %s1564_s10 = sand.u32 4294901760, %s1563_s2  ;;  %s3700_s11 = sld [smem:[#allocation10 + $0x16]] }
  0xa6   :  { %s5140_s10 = smov (%p1559_p13, %s1564_s10), 2143289344  ;;  %p1723_p0 = scmp.ne.f32.partialorder %s2796_s18, %s2796_s18 }
  0xa7   :  { %s1724_s7 = sshrl.u32 %s2796_s18, 16  ;;  %s1567_s25 = sshrl.u32 %s5140_s10, 16 }
  0xa8   :  { %s1725_s16 = sand.u32 1, %s1724_s7  ;;  %s1644_s23 = sshll.u32 %s1567_s25, 16 }
  0xa9   :  { %s1726_s8 = sadd.s32 32767, %s1725_s16  ;;  %s1645_s26 = sor.u32 %s1644_s23, %s1567_s25 }
  0xaa   :  { %s1727_s5 = sadd.s32 %s2796_s18, %s1726_s8  ;;  %s3717_s9 = sld [smem:[#allocation10 + $0x14]]  ;;  %v3737_v30 = vstv %s1645_s26 }
  0xab   :  { %s1728_s4 = sand.u32 4294901760, %s1727_s5  ;;  %p2098_p1 = scmp.ne.f32.partialorder %s3700_s11, %s3700_s11  ;;  %4988 = vst [vmem:[#allocation29_spill] sm:$0xff] %v3737_v30  ;;  %v1648_v44 = vmul.bf16 %v3737_v30, %v3384_v0  ;;  %v1649_v47 = vmul.bf16 %v3737_v30, %v3386_v1 }
  0xac   :  { %s5142_s4 = smov (%p1723_p0, %s1728_s4), 2143289344  ;;  %s2099_s27 = sshrl.u32 %s3700_s11, 16 }
  0xad   :  { %s1731_s17 = sshrl.u32 %s5142_s4, 16  ;;  %s2100_s19 = sand.u32 1, %s2099_s27  ;;  %v2788_v63 = vcombine.low %v1648_v44, %v1649_v47 }
  0xae   :  { %s1744_s29 = sshll.u32 %s1731_s17, 16  ;;  %s2101_s24 = sadd.s32 32767, %s2100_s19 }
  0xaf   :  { %s3748_s30 = sor.u32 %s1744_s29, %s1731_s17  ;;  %s2102_s13 = sadd.s32 %s3700_s11, %s2101_s24 }
  0xb0   :  { %s2103_s0 = sand.u32 4294901760, %s2102_s13  ;;  %s3759_s14 = sld [smem:[#allocation10 + $0x1]]  ;;  %v3786_v11 = vstv %s3748_s30 }
  0xb1   :  { %s5144_s0 = smov (%p2098_p1, %s2103_s0), 2143289344  ;;  %p2262_p2 = scmp.ne.f32.partialorder %s3717_s9, %s3717_s9  ;;  %4989 = vst [vmem:[#allocation30_spill] sm:$0xff] %v3786_v11 }
  0xb2   :  { %s2263_s18 = sshrl.u32 %s3717_s9, 16  ;;  %s2106_s1 = sshrl.u32 %s5144_s0, 16 }
  0xb3   :  { %s2264_s6 = sand.u32 1, %s2263_s18  ;;  %s2183_s3 = sshll.u32 %s2106_s1, 16 }
  0xb4   :  { %s2265_s2 = sadd.s32 32767, %s2264_s6  ;;  %s2184_s10 = sor.u32 %s2183_s3, %s2106_s1 }
  0xb5   :  { %s2266_s11 = sadd.s32 %s3717_s9, %s2265_s2  ;;  %v3800_v31 = vstv %s2184_s10  ;;  %s3812_s16 = sld [smem:[#allocation10 + $0x4]] }
  0xb6   :  { %s2267_s7 = sand.u32 4294901760, %s2266_s11  ;;  %p470_p3 = scmp.ne.f32.partialorder %s3759_s14, %s3759_s14  ;;  %4990 = vst [vmem:[#allocation31_spill] sm:$0xff] %v3800_v31  ;;  %v2187_v44 = vmul.bf16 %v3800_v31, %v3384_v0  ;;  %v2188_v9 = vmul.bf16 %v3800_v31, %v3386_v1 }
  0xb7   :  { %s5146_s7 = smov (%p2262_p2, %s2267_s7), 2143289344  ;;  %s471_s25 = sshrl.u32 %s3759_s14, 16 }
  0xb8   :  { %s2270_s23 = sshrl.u32 %s5146_s7, 16  ;;  %s472_s8 = sand.u32 1, %s471_s25  ;;  %v2819_v0 = vcombine.low %v2187_v44, %v2188_v9 }
  0xb9   :  { %v307_v19 = vpop.permute.xlu1 %306  ;;  %s2283_s26 = sshll.u32 %s2270_s23, 16  ;;  %s473_s5 = sadd.s32 32767, %s472_s8 }
  0xba   :  { %v3723_v21 = vsel %vm199_vm0, 0, %v307_v19  ;;  %v184_v24 = vpop.permute.xlu0 %183  ;;  %s2284_s4 = sor.u32 %s2283_s26, %s2270_s23  ;;  %s474_s27 = sadd.s32 %s3759_s14, %s473_s5 }
  0xbb   :  { %v3746_v36 = vsel %vm199_vm0, 0, %v184_v24  ;;  %v1528_v37 = vmul.bf16 %v3714_v16, %v3723_v21  ;;  %v2067_v38 = vmul.bf16 %v3720_v20, %v3723_v21  ;;  %s475_s9 = sand.u32 4294901760, %s474_s27  ;;  %s3833_s17 = sld [smem:[#allocation10 + $0x7]] }
  0xbc   :  { %v1508_v3 = vmul.bf16 %v3726_v22, %v3746_v36  ;;  %v2047_v4 = vmul.bf16 %v3729_v23, %v3746_v36  ;;  %s5148_s9 = smov (%p470_p3, %s475_s9), 2143289344  ;;  %p482_p4 = scmp.ne.f32.partialorder %s3812_s16, %s3812_s16 }
  0xbd   :  { %v309_v41 = vpop.permute.xlu1 %308  ;;  %s483_s19 = sshrl.u32 %s3812_s16, 16  ;;  %s478_s29 = sshrl.u32 %s5148_s9, 16 }
  0xbe   :  { %v1516_v48 = vadd.bf16 %v1508_v3, %v3733_v26  ;;  %v2055_v49 = vadd.bf16 %v2047_v4, %v3735_v27  ;;  %v3771_v52 = vsel %vm199_vm0, 0, %v309_v41  ;;  %v186_v53 = vpop.permute.xlu0 %185  ;;  %v1650_v4 = vmul.bf16 %v3737_v30, %v3402_v6  ;;  %s484_s24 = sand.u32 1, %s483_s19  ;;  %s3894_s14 = sld [smem:[#allocation10 + $0xa]] }
  0xbf   :  { %v1529_v61 = vmul.bf16 %v3714_v16, %v3771_v52  ;;  %v3783_v62 = vsel %vm199_vm0, 0, %v186_v53  ;;  %v2068_v14 = vmul.bf16 %v3720_v20, %v3771_v52  ;;  %v1651_v41 = vmul.bf16 %v3737_v30, %v3404_v7  ;;  %s4995_s18 = sld [smem:[#allocation21_spill]] }
  0xc0   :  { %v1536_v56 = vadd.bf16 %v1528_v37, %v1516_v48  ;;  %v2075_v57 = vadd.bf16 %v2067_v38, %v2055_v49  ;;  %v1509_v19 = vmul.bf16 %v3726_v22, %v3783_v62  ;;  %v2048_v24 = vmul.bf16 %v3729_v23, %v3783_v62  ;;  %s4996_s3 = sld [smem:[#allocation22_spill]] }
  0xc1   :  { %v226_v58 = vpop.permute.xlu1 %225  ;;  %v2114_v37 = vmul.bf16 %v3711_v15, %v3414_v10  ;;  %v2781_v53 = vcombine.low %v1574_v59, %v1575_v60  ;;  %p1008_p5 = scmp.ne.f32.partialorder %s3833_s17, %s3833_s17  ;;  %s1009_s0 = sshrl.u32 %s3833_s17, 16 }
  0xc2   :  { %v3796_v25 = vsel %vm241_vm1, %v226_v58, 0  ;;  %v1636_v32 = vadd.bf16 %v2780_v54, %v1536_v56  ;;  %v1517_v38 = vadd.bf16 %v1509_v19, %v3733_v26  ;;  %v2056_v3 = vadd.bf16 %v2048_v24, %v3735_v27  ;;  %s1010_s6 = sand.u32 1, %s1009_s0  ;;  %s3934_s25 = sld [smem:[#allocation10 + $0x11]] }
  0xc3   :  { %v1748_v47 = vmul.bf16 %v3786_v11, %v3796_v25  ;;  %v1576_v54 = vmul.bf16 %v3705_v8, %v3419_v12  ;;  %v2175_v1 = vadd.bf16 %v2811_v55, %v2075_v57  ;;  %v1577_v58 = vmul.bf16 %v3705_v8, %v3421_v13  ;;  %s1011_s10 = sadd.s32 32767, %s1010_s6 }
  0xc4   :  { %v1712_v10 = vadd.bf16 %v2788_v63, %v1636_v32  ;;  %v1537_v48 = vadd.bf16 %v1529_v61, %v1517_v38  ;;  %v2076_v49 = vadd.bf16 %v2068_v14, %v2056_v3  ;;  %v3831_v61 = vstv %s2284_s4  ;;  %s1012_s7 = sadd.s32 %s3833_s17, %s1011_s10  ;;  %p1020_p6 = scmp.ne.f32.partialorder %s3894_s14, %s3894_s14 }
  0xc5   :  { %4992 = vst [vmem:[#allocation33_spill] sm:$0xff] %v3831_v61  ;;  %v2812_v59 = vcombine.low %v2113_v33, %v2114_v37  ;;  %v228_v60 = vpop.permute.xlu1 %227  ;;  %v2115_v63 = vmul.bf16 %v3711_v15, %v3419_v12  ;;  %v2116_v55 = vmul.bf16 %v3711_v15, %v3421_v13  ;;  %v2251_v57 = vadd.bf16 %v2819_v0, %v2175_v1 }
  0xc6   :  { %v3826_v56 = vadd.bf16 %v1748_v47, %v1712_v10  ;;  %v2287_v14 = vmul.bf16 %v3831_v61, %v3796_v25  ;;  %v2789_v19 = vcombine.low %v1650_v4, %v1651_v41  ;;  %v2189_v24 = vmul.bf16 %v3800_v31, %v3402_v6 }
  0xc7   :  { %v3847_v32 = vstv %s3558_s12  ;;  %v3850_v33 = vstv %s3585_s20  ;;  %v2190_v12 = vmul.bf16 %v3800_v31, %v3404_v7  ;;  %v3860_v37 = vsel %vm241_vm1, %v228_v60, 0  ;;  %s485_s12 = sadd.s32 32767, %s484_s24  ;;  %s491_s20 = sshll.u32 %s478_s29, 16 }
  0xc8   :  { %4991 = vst [vmem:[#allocation32_spill] sm:$0xff] %v3826_v56  ;;  %v3857_v13 = vadd.bf16 %v2287_v14, %v2251_v57  ;;  %v1637_v6 = vadd.bf16 %v2781_v53, %v1537_v48  ;;  %v3862_v38 = vcombine.low %v1576_v54, %v1577_v58  ;;  %v401_v3 = vstv %s3629_s15  ;;  %s486_s30 = sadd.s32 %s3812_s16, %s485_s12  ;;  %s3870_s13 = sor.u32 %s491_s20, %s478_s29 }
  0xc9   :  { %v2820_v4 = vcombine.low %v2189_v24, %v2190_v12  ;;  %v1749_v7 = vmul.bf16 %v3786_v11, %v3860_v37  ;;  %v3867_v41 = vcombine.low %v2115_v63, %v2116_v55  ;;  %v2176_v9 = vadd.bf16 %v2812_v59, %v2076_v49  ;;  %s487_s15 = sand.u32 4294901760, %s486_s30  ;;  %s1021_s16 = sshrl.u32 %s3894_s14, 16 }
  0xca   :  { %4993 = vst [vmem:[#allocation34_spill] sm:$0xff] %v3857_v13  ;;  %v1713_v44 = vadd.bf16 %v2789_v19, %v1637_v6  ;;  %v2288_v10 = vmul.bf16 %v3831_v61, %v3860_v37  ;;  %v1578_v47 = vmul.bf16 %v3705_v8, %v3434_v17  ;;  %v1579_v48 = vmul.bf16 %v3705_v8, %v3436_v18  ;;  %s5150_s15 = smov (%p482_p4, %s487_s15), 2143289344  ;;  %v188_v6 = vpop.permute.xlu0 %187  ;;  %s1022_s8 = sand.u32 1, %s1021_s16  ;;  %v3175_v13 = vld [vmem:[#allocation3 + $0x4] sm:$0xf] }
  0xcb   :  { %v2117_v53 = vmul.bf16 %v3711_v15, %v3434_v17  ;;  %v2118_v54 = vmul.bf16 %v3711_v15, %v3436_v18  ;;  %v3884_v0 = vadd.bf16 0, %v401_v3  ;;  %v2252_v1 = vadd.bf16 %v2820_v4, %v2176_v9  ;;  %s490_s1 = sshrl.u32 %s5150_s15, 16  ;;  %s1023_s26 = sadd.s32 32767, %s1022_s8 }
  0xcc   :  { %v3889_v49 = vadd.bf16 %v1749_v7, %v1713_v44  ;;  %v1580_v58 = vmul.bf16 %v3705_v8, %v3474_v28  ;;  %v1581_v17 = vmul.bf16 %v3705_v8, %v3476_v29  ;;  %v2119_v18 = vmul.bf16 %v3711_v15, %v3474_v28  ;;  %s567_s2 = sshll.u32 %s490_s1, 16  ;;  %s1024_s4 = sadd.s32 %s3894_s14, %s1023_s26 }
  0xcd   :  { %4994 = vst [vmem:[#allocation35_spill] sm:$0xff] %v3884_v0  ;;  %v2120_v59 = vmul.bf16 %v3711_v15, %v3476_v29  ;;  %v1582_v60 = vmul.bf16 %v3705_v8, %v3497_v34  ;;  %v3904_v63 = vadd.bf16 %v2288_v10, %v2252_v1  ;;  %v1583_v55 = vmul.bf16 %v3705_v8, %v3499_v35  ;;  %s3922_s11 = sor.u32 %s567_s2, %s490_s1  ;;  %s1025_s9 = sand.u32 4294901760, %s1024_s4 }
  0xce   :  { %v2121_v57 = vmul.bf16 %v3711_v15, %v3497_v34  ;;  %v2122_v28 = vmul.bf16 %v3711_v15, %v3499_v35  ;;  %v3913_v14 = vstv %s3637_s21  ;;  %v3915_v29 = vcombine.low %v1578_v47, %v1579_v48  ;;  %s1013_s21 = sand.u32 4294901760, %s1012_s7  ;;  %p1735_p7 = scmp.ne.f32.partialorder %s3934_s25, %s3934_s25 }
  0xcf   :  { %4997 = vst [vmem:[#allocation36_spill] sm:$0xff] %v3913_v14  ;;  %v1584_v19 = vmul.bf16 %v3705_v8, %v3554_v45  ;;  %v1585_v24 = vmul.bf16 %v3705_v8, %v3556_v46  ;;  %v939_v12 = vstv %s4995_s18  ;;  %v3925_v34 = vcombine.low %v2117_v53, %v2118_v54  ;;  %s5152_s21 = smov (%p1008_p5, %s1013_s21), 2143289344  ;;  %s5154_s9 = smov (%p1020_p6, %s1025_s9), 2143289344 }
  0xd0   :  { %v2123_v35 = vmul.bf16 %v3711_v15, %v3554_v45  ;;  %v2124_v3 = vmul.bf16 %v3711_v15, %v3556_v46  ;;  %v3932_v4 = vstv %s4996_s3  ;;  %v3936_v7 = vcombine.low %v1580_v58, %v1581_v17  ;;  %s1016_s23 = sshrl.u32 %s5152_s21, 16  ;;  %v3969_v58 = vld [vmem:[#allocation7 + $0x10] sm:$0xf]  ;;  %s1028_s17 = sshrl.u32 %s5154_s9, 16 }
  0xd1   :  { %4998 = vst [vmem:[#allocation37_spill] sm:$0xff] %v3932_v4  ;;  %v1586_v44 = vmul.bf16 %v3705_v8, %v3572_v50  ;;  %v1587_v9 = vmul.bf16 %v3705_v8, %v3574_v51  ;;  %v431_v10 = vmul.bf16 %v3913_v14, %v3746_v36  ;;  %v3949_v45 = vcombine.low %v2119_v18, %v2120_v59  ;;  %v3973_v18 = vld [vmem:[#allocation7 + $0x14] sm:$0xf]  ;;  %s1029_s5 = sshll.u32 %s1016_s23, 16  ;;  %s1105_s29 = sshll.u32 %s1028_s17, 16 }
  0xd2   :  { %4999 = vst [vmem:[#allocation38_spill] sm:$0xff] %v3936_v7  ;;  %v3951_v46 = vcombine.low %v1582_v60, %v1583_v55  ;;  %v3953_v47 = vcombine.low %v2121_v57, %v2122_v28  ;;  %v3955_v48 = vadd.bf16 0, %v939_v12  ;;  %v3960_v53 = vcombine.low %v1584_v19, %v1585_v24  ;;  %v3985_v60 = vld [vmem:[#allocation7 + $0x1c] sm:$0xf]  ;;  %s3995_s27 = sor.u32 %s1029_s5, %s1016_s23  ;;  %v190_v24 = vpop.permute.xlu0 %189  ;;  %s4050_s12 = sor.u32 %s1105_s29, %s1028_s17  ;;  %v4127_v7 = vld [vmem:[#allocation7 + $0x8] sm:$0xf] }
  0xd3   :  { %5000 = vst [vmem:[#allocation39_spill] sm:$0xff] %v3949_v45  ;;  %v2125_v8 = vmul.bf16 %v3711_v15, %v3572_v50  ;;  %v2126_v54 = vmul.bf16 %v3711_v15, %v3574_v51  ;;  %v969_v1 = vmul.bf16 %v3932_v4, %v3746_v36  ;;  %v1652_v17 = vmul.bf16 %v3969_v58, %v3737_v30  ;;  %v3981_v15 = vld [vmem:[#allocation7 + $0x18] sm:$0xf]  ;;  %s4066_s15 = sld [smem:[#allocation10 + $0x5]] }
  0xd4   :  { %5001 = vst [vmem:[#allocation40_spill] sm:$0xff] %v3951_v46  ;;  %5002 = vst [vmem:[#allocation41_spill] sm:$0xff] %v3953_v47  ;;  %v1653_v59 = vmul.bf16 %v3973_v18, %v3737_v30  ;;  %v3977_v50 = vcombine.low %v2123_v35, %v2124_v3  ;;  %v432_v51 = vmul.bf16 %v3913_v14, %v3783_v62 }
  0xd5   :  { %5003 = vst [vmem:[#allocation42_spill] sm:$0xff] %v3955_v48  ;;  %5004 = vst [vmem:[#allocation43_spill] sm:$0xff] %v3960_v53  ;;  %v1654_v36 = vmul.bf16 %v3981_v15, %v3737_v30  ;;  %v1655_v55 = vmul.bf16 %v3985_v60, %v3737_v30  ;;  %v3989_v57 = vcombine.low %v1586_v44, %v1587_v9  ;;  %v4004_v44 = vstv %s3696_s28  ;;  %s1736_s28 = sshrl.u32 %s3934_s25, 16 }
  0xd6   :  { %5005 = vst [vmem:[#allocation44_spill] sm:$0xff] %v3977_v50  ;;  %5006 = vst [vmem:[#allocation45_spill] sm:$0xff] %v3981_v15  ;;  %v451_v28 = vmul.bf16 %v3847_v32, %v3723_v21  ;;  %v439_v19 = vadd.bf16 %v431_v10, %v3884_v0  ;;  %v1656_v12 = vmul.bf16 %v3737_v30, %v3517_v39  ;;  %v4007_v9 = vstv %s3698_s22  ;;  %v4020_v50 = vpop.permute.xlu1 %346  ;;  %s4031_s22 = sld [smem:[#allocation10 + $0x17]]  ;;  %s1737_s19 = sand.u32 1, %s1736_s28 }
  0xd7   :  { %5007 = vst [vmem:[#allocation46_spill] sm:$0xff] %v3985_v60  ;;  %5008 = vst [vmem:[#allocation47_spill] sm:$0xff] %v3989_v57  ;;  %v1657_v35 = vmul.bf16 %v3737_v30, %v3519_v40  ;;  %v970_v3 = vmul.bf16 %v3932_v4, %v3783_v62  ;;  %v4011_v10 = vcombine.low %v2125_v8, %v2126_v54  ;;  %v208_v40 = vsel %vm199_vm0, 0, %v188_v6  ;;  %s1738_s24 = sadd.s32 32767, %s1737_s19  ;;  %v4185_v60 = vld [vmem:[#allocation3 + $0x14] sm:$0xf] }
  0xd8   :  { %v989_v57 = vmul.bf16 %v3850_v33, %v3723_v21  ;;  %v977_v39 = vadd.bf16 %v969_v1, %v3955_v48  ;;  %v4022_v62 = vcombine.low %v1652_v17, %v1653_v59  ;;  %v452_v53 = vmul.bf16 %v3847_v32, %v3771_v52  ;;  %s1739_s20 = sadd.s32 %s3934_s25, %s1738_s24 }
  0xd9   :  { %5009 = vst [vmem:[#allocation48_spill] sm:$0xff] %v4011_v10  ;;  %v440_v47 = vadd.bf16 %v432_v51, %v3884_v0  ;;  %v4028_v8 = vsel %vm199_vm0, 0, %v190_v24  ;;  %v4033_v21 = vcombine.low %v1654_v36, %v1655_v55  ;;  %v4035_v6 = vadd.bf16 %v451_v28, %v439_v19  ;;  %s1740_s30 = sand.u32 4294901760, %s1739_s20  ;;  %p658_p9 = scmp.ne.f32.partialorder %s4066_s15, %s4066_s15 }
  0xda   :  { %5010 = vst [vmem:[#allocation49_spill] sm:$0xff] %v4022_v62  ;;  %v990_v54 = vmul.bf16 %v3850_v33, %v3771_v52  ;;  %v4039_v1 = vcombine.low %v1656_v12, %v1657_v35  ;;  %v978_v59 = vadd.bf16 %v970_v3, %v3955_v48  ;;  %v433_v51 = vmul.bf16 %v3913_v14, %v208_v40  ;;  %s5156_s30 = smov (%p1735_p7, %s1740_s30), 2143289344  ;;  %s659_s10 = sshrl.u32 %s4066_s15, 16 }
  0xdb   :  { %5011 = vst [vmem:[#allocation50_spill] sm:$0xff] %v4033_v21  ;;  %v971_v36 = vmul.bf16 %v3932_v4, %v208_v40  ;;  %v1510_v55 = vmul.bf16 %v3726_v22, %v208_v40  ;;  %v4047_v28 = vadd.bf16 %v989_v57, %v977_v39  ;;  %v2049_v52 = vmul.bf16 %v3729_v23, %v208_v40  ;;  %v4068_v39 = vld [vmem:[#allocation3 + $0x8] sm:$0xf]  ;;  %v349_v57 = vpop.permute.xlu1 %348  ;;  %s1743_s0 = sshrl.u32 %s5156_s30, 16  ;;  %s660_s21 = sand.u32 1, %s659_s10 }
  0xdc   :  { %5012 = vst [vmem:[#allocation51_spill] sm:$0xff] %v4039_v1  ;;  %v434_v19 = vmul.bf16 %v3913_v14, %v4028_v8  ;;  %v4057_v12 = vadd.bf16 %v452_v53, %v440_v47  ;;  %v4064_v3 = vstv %s3870_s13  ;;  %v4072_v47 = vld [vmem:[#allocation3 + $0xc] sm:$0xf]  ;;  %v972_v17 = vmul.bf16 %v3932_v4, %v4028_v8  ;;  %p2274_p8 = scmp.ne.f32.partialorder %s4031_s22, %s4031_s22  ;;  %s2275_s13 = sshrl.u32 %s4031_s22, 16  ;;  %v311_v1 = vpop.permute.xlu0 %310 }
  0xdd   :  { %v497_v40 = vmul.bf16 %v4068_v39, %v4064_v3  ;;  %v498_v53 = vmul.bf16 %v4072_v47, %v4064_v3  ;;  %v1511_v24 = vmul.bf16 %v3726_v22, %v4028_v8  ;;  %v4083_v35 = vadd.bf16 %v990_v54, %v978_v59  ;;  %s2276_s14 = sand.u32 1, %s2275_s13  ;;  %s1764_s18 = sshll.u32 %s1743_s0, 16  ;;  %v4153_v22 = vld [vmem:[#allocation7 + $0x4] sm:$0xf] }
  0xde   :  { %v4086_v10 = vadd.bf16 %v433_v51, %v3884_v0  ;;  %v4089_v42 = vadd.bf16 %v971_v36, %v3955_v48  ;;  %v4092_v43 = vadd.bf16 %v1510_v55, %v3733_v26  ;;  %v4098_v46 = vadd.bf16 %v2049_v52, %v3735_v27  ;;  %s2277_s1 = sadd.s32 32767, %s2276_s14  ;;  %v3174_v52 = vld [vmem:[#allocation3] sm:$0xf]  ;;  %s1765_s6 = sor.u32 %s1764_s18, %s1743_s0 }
  0xdf   :  { %v4105_v51 = vadd.bf16 %v434_v19, %v3884_v0  ;;  %v4108_v36 = vstv %s3922_s11  ;;  %v4111_v55 = vsel %vm241_vm1, %v349_v57, 0  ;;  %v495_v54 = vmul.bf16 %v3174_v52, %v4064_v3  ;;  %s2278_s3 = sadd.s32 %s4031_s22, %s2277_s1  ;;  %v4131_v0 = vld [vmem:[#allocation7 + $0xc] sm:$0xf]  ;;  %s4168_s11 = sld [smem:[#allocation10 + $0xb]] }
  0xe0   :  { %v496_v19 = vmul.bf16 %v3175_v13, %v4064_v3  ;;  %v4115_v59 = vcombine.low %v497_v40, %v498_v53  ;;  %v4118_v56 = vadd.bf16 %v972_v17, %v3955_v48  ;;  %v4121_v45 = vadd.bf16 %v1511_v24, %v3733_v26  ;;  %s2279_s2 = sand.u32 4294901760, %s2278_s3  ;;  %v4149_v26 = vld [vmem:[#allocation7] sm:$0xf]  ;;  %s661_s16 = sadd.s32 32767, %s660_s21 }
  0xe1   :  { %v4125_v57 = vsel %vm199_vm0, 0, %v311_v1  ;;  %v573_v21 = vmul.bf16 %v4127_v7, %v4108_v36  ;;  %v574_v40 = vmul.bf16 %v4131_v0, %v4108_v36  ;;  %v4136_v17 = vstv %s3995_s27  ;;  %s5158_s2 = smov (%p2274_p8, %s2279_s2), 2143289344  ;;  %s662_s8 = sadd.s32 %s4066_s15, %s661_s16 }
  0xe2   :  { %v4138_v24 = vstv %s1765_s6  ;;  %v2718_v53 = vcombine.low %v495_v54, %v496_v19  ;;  %v571_v48 = vmul.bf16 %v4149_v26, %v4108_v36  ;;  %v572_v4 = vmul.bf16 %v4153_v22, %v4108_v36  ;;  %s2282_s7 = sshrl.u32 %s5158_s2, 16  ;;  %s663_s26 = sand.u32 4294901760, %s662_s8 }
  0xe3   :  { %5013 = vst [vmem:[#allocation52_spill] sm:$0xff] %v4138_v24  ;;  %v1769_v1 = vmul.bf16 %v4138_v24, %v4111_v55  ;;  %v1035_v14 = vmul.bf16 %v4068_v39, %v4136_v17  ;;  %v1036_v62 = vmul.bf16 %v4072_v47, %v4136_v17  ;;  %v2050_v54 = vmul.bf16 %v3729_v23, %v4028_v8  ;;  %v4171_v24 = vld [vmem:[#allocation3 + $0x10] sm:$0xf]  ;;  %s2303_s25 = sshll.u32 %s2282_s7, 16  ;;  %s5160_s26 = smov (%p658_p9, %s663_s26), 2143289344 }
  0xe4   :  { %v4165_v19 = vsel %vm241_vm1, %v4020_v50, 0  ;;  %v499_v39 = vmul.bf16 %v4171_v24, %v4064_v3  ;;  %v1033_v8 = vmul.bf16 %v3174_v52, %v4136_v17  ;;  %v1034_v23 = vmul.bf16 %v3175_v13, %v4136_v17  ;;  %s2304_s23 = sor.u32 %s2303_s25, %s2282_s7  ;;  %s666_s4 = sshrl.u32 %s5160_s26, 16 }
  0xe5   :  { %5014 = vst [vmem:[#allocation53_spill] sm:$0xff] %v4165_v19  ;;  %v4176_v47 = vadd.bf16 %v1769_v1, %v3889_v49  ;;  %v4181_v50 = vstv %s4050_s12  ;;  %v560_v5 = vadd.bf16 %v4115_v59, %v4057_v12  ;;  %v500_v15 = vmul.bf16 %v4185_v60, %v4064_v3  ;;  %p1196_p10 = scmp.ne.f32.partialorder %s4168_s11, %s4168_s11  ;;  %s1197_s5 = sshrl.u32 %s4168_s11, 16 }
  0xe6   :  { %v453_v49 = vmul.bf16 %v3847_v32, %v4125_v57  ;;  %v2727_v52 = vcombine.low %v573_v21, %v574_v40  ;;  %v991_v13 = vmul.bf16 %v3850_v33, %v4125_v57  ;;  %v559_v12 = vadd.bf16 %v2718_v53, %v4035_v6  ;;  %v313_v21 = vpop.permute.xlu0 %312  ;;  %s1198_s27 = sand.u32 1, %s1197_s5  ;;  %s687_s9 = sshll.u32 %s666_s4, 16 }
  0xe7   :  { %5015 = vst [vmem:[#allocation54_spill] sm:$0xff] %v4176_v47  ;;  %v2726_v59 = vcombine.low %v571_v48, %v572_v4  ;;  %v2750_v1 = vcombine.low %v1035_v14, %v1036_v62  ;;  %v1111_v47 = vmul.bf16 %v4127_v7, %v4181_v50  ;;  %v1112_v61 = vmul.bf16 %v4131_v0, %v4181_v50  ;;  %s1199_s28 = sadd.s32 32767, %s1198_s27  ;;  %s688_s22 = sor.u32 %s687_s9, %s666_s4 }
  0xe8   :  { %v4199_v11 = vstv %s2304_s23  ;;  %v2749_v6 = vcombine.low %v1033_v8, %v1034_v23  ;;  %v1109_v14 = vmul.bf16 %v4149_v26, %v4181_v50  ;;  %v1110_v4 = vmul.bf16 %v4153_v22, %v4181_v50  ;;  %s1200_s17 = sadd.s32 %s4168_s11, %s1199_s28  ;;  %s5103_s15 = sld [smem:[#allocation60_spill]] }
  0xe9   :  { %5016 = vst [vmem:[#allocation55_spill] sm:$0xff] %v4199_v11  ;;  %v2308_v40 = vmul.bf16 %v4199_v11, %v4111_v55  ;;  %v4211_v7 = vadd.bf16 %v2050_v54, %v3735_v27  ;;  %v4213_v0 = vcombine.low %v499_v39, %v500_v15  ;;  %v1530_v48 = vmul.bf16 %v3714_v16, %v4125_v57  ;;  %s1201_s19 = sand.u32 4294901760, %s1200_s17  ;;  %s3324_s13 = smov [#allocation13]  }
  0xea   :  { %v2069_v62 = vmul.bf16 %v3720_v20, %v4125_v57  ;;  %v636_v23 = vadd.bf16 %v2727_v52, %v560_v5  ;;  %v4226_v26 = vsel %vm199_vm0, 0, %v313_v21  ;;  %v635_v15 = vadd.bf16 %v2726_v59, %v559_v12  ;;  %v4234_v57 = vld [vmem:[#allocation3 + $0x18] sm:$0xf]  ;;  %s5162_s19 = smov (%p1196_p10, %s1201_s19), 2143289344  ;;  %s2684_s0 = sshll.u32 %s3324_s13, 4  ;;  %s2685_s0 = int_to_ptr.vmem [resolvable:$true] %s2684_s0 }
  0xeb   :  { %v4223_v22 = vadd.bf16 %v2308_v40, %v3904_v63  ;;  %v4229_v53 = vadd.bf16 %v453_v49, %v4086_v10  ;;  %v4232_v54 = vadd.bf16 %v991_v13, %v4089_v42  ;;  %v501_v5 = vmul.bf16 %v4234_v57, %v4064_v3  ;;  %v4238_v63 = vld [vmem:[#allocation3 + $0x1c] sm:$0xf]  ;;  %s1204_s29 = sshrl.u32 %s5162_s19, 16  ;;  %s3284_s14 = scalar_lea.vmem %s2685_s0, 1024 }
  0xec   :  { %v502_v39 = vmul.bf16 %v4238_v63, %v4064_v3  ;;  %v2758_v8 = vcombine.low %v1111_v47, %v1112_v61  ;;  %v1098_v10 = vadd.bf16 %v2750_v1, %v4083_v35  ;;  %v1097_v42 = vadd.bf16 %v2749_v6, %v4047_v28  ;;  %v4268_v1 = vpop.permute.xlu0 %191  ;;  %s1225_s24 = sshll.u32 %s1204_s29, 16  ;;  %p3285_p11 = scmp.ne.s32.totalorder %s2685_s0, %s3284_s14 }
  0xed   :  { %5017 = vst [vmem:[#allocation56_spill] sm:$0xff] %v4223_v22  ;;  %v2757_v49 = vcombine.low %v1109_v14, %v1110_v4  ;;  %v4246_v52 = vadd.bf16 %v1530_v48, %v4092_v43  ;;  %v4249_v13 = vadd.bf16 %v2069_v62, %v4098_v46  ;;  %v4251_v12 = vstv %s688_s22  ;;  %v230_v4 = vpop.permute.xlu1 %229  ;;  %s1226_s12 = sor.u32 %s1225_s24, %s1204_s29  ;;  %p3289_p12 = scmp.lt.s32.totalorder %s2685_s0, %s2685_s0 }
  0xee   :  { %v454_v59 = vmul.bf16 %v3847_v32, %v4226_v26  ;;  %v5018_v61 = vmul.bf16 %v4004_v44, %v3860_v37  ;;  %v692_v28 = vmul.bf16 %v4251_v12, %v4111_v55  ;;  %v5019_v43 = vmul.bf16 %v4004_v44, %v3796_v25  ;;  %v5037_v22 = vld [vmem:[#allocation54_spill] sm:$0xff]  ;;  %p3290_p13 = scmp.lt.s32.totalorder %s3284_s14, %s3284_s14 }
  0xef   :  { %v691_v47 = vmul.bf16 %v4251_v12, %v4165_v19  ;;  %v561_v21 = vadd.bf16 %v4213_v0, %v4229_v53  ;;  %v4272_v40 = vcombine.low %v501_v5, %v502_v39  ;;  %v992_v6 = vmul.bf16 %v3850_v33, %v4226_v26 }
  0xf0   :  { %v680_v35 = vadd.bf16 %v5018_v61, %v636_v23  ;;  %v679_v46 = vadd.bf16 %v5019_v43, %v635_v15  ;;  %v1531_v14 = vmul.bf16 %v3714_v16, %v4226_v26  ;;  %v1174_v48 = vadd.bf16 %v2758_v8, %v1098_v10  ;;  %p3291_p0 = por %p3290_p13, %p3289_p12 }
  0xf1   :  { %v1173_v23 = vadd.bf16 %v2757_v49, %v1097_v42  ;;  %v4279_v61 = vadd.bf16 %v454_v59, %v4105_v51  ;;  %v2070_v0 = vmul.bf16 %v3720_v20, %v4226_v26  ;;  %v575_v53 = vmul.bf16 %v3969_v58, %v4108_v36 }
  0xf2   :  { %v699_v62 = vadd.bf16 %v691_v47, %v679_v46  ;;  %v700_v15 = vadd.bf16 %v692_v28, %v680_v35  ;;  %v576_v5 = vmul.bf16 %v3973_v18, %v4108_v36  ;;  %v1037_v39 = vmul.bf16 %v4171_v24, %v4136_v17  ;;  %v3154_v24 = vld [vmem:[#allocation9 + $0xb0] sm:$0xff]   ;;  %p3292_p1 = pnand %p3291_p0, %p3285_p11 }
  0xf3   :  { %v1038_v8 = vmul.bf16 %v4185_v60, %v4136_v17  ;;  %v4939_v10 = vmov 0   ;;  %v4293_v49 = vstv %s1226_s12  ;;  %v1039_v26 = vmul.bf16 %v4234_v57, %v4136_v17 }
  0xf4   :  { %v707_v51 = vmax.bf16 %v4939_v10, %v699_v62  ;;  %v708_v42 = vmax.bf16 %v4939_v10, %v700_v15  ;;  %v1040_v59 = vmul.bf16 %v4238_v63, %v4136_v17  ;;  %v4300_v35 = vadd.bf16 %v1531_v14, %v4121_v45  ;;  %v4312_v63 = vpop.permute.xlu0 %193 }
  0xf5   :  { %v5020_v60 = vmul.bf16 %v4007_v9, %v3860_v37  ;;  %v1230_v43 = vmul.bf16 %v4293_v49, %v4111_v55  ;;  %v5021_v46 = vmul.bf16 %v4007_v9, %v3796_v25  ;;  %v1229_v57 = vmul.bf16 %v4293_v49, %v4165_v19 }
  0xf6   :  { %2997 = vmatprep.mubr.bf16.mxu0 %v707_v51  ;;  %v4315_v45 = vadd.bf16 %v2070_v0, %v4211_v7  ;;  %v2728_v14 = vcombine.low %v575_v53, %v576_v5  ;;  %v2191_v37 = vmul.bf16 %v3969_v58, %v3800_v31  ;;  %v2192_v55 = vmul.bf16 %v3973_v18, %v3800_v31 }
  0xf7   :  { %v1218_v28 = vadd.bf16 %v5020_v60, %v1174_v48  ;;  %v1217_v47 = vadd.bf16 %v5021_v46, %v1173_v23  ;;  %v4321_v48 = vpop.permute.xlu1 %231  ;;  %2998 = vmatmul.mubr.bf16.vlgmr.msra.gmra.mxu0 %v708_v42  ;;  %v2751_v25 = vcombine.low %v1037_v39, %v1038_v8  ;;  %v249_v62 = vsel %vm241_vm1, %v230_v4, 0  ;;  %v3155_v42 = vld [vmem:[#allocation9 + $0xf0] sm:$0xff]  }
  0xf8   :  { %3046 = vmatpush3.bf16.msra.mxu0 %v3673_v2  ;;  %v4325_v51 = vcombine.low %v1039_v26, %v1040_v59  ;;  %v4328_v7 = vadd.bf16 %v992_v6, %v4118_v56  ;;  %v1113_v0 = vmul.bf16 %v3969_v58, %v4181_v50  ;;  %v1114_v53 = vmul.bf16 %v3973_v18, %v4181_v50  ;;  %v4338_v2 = vld [vmem:[#allocation7 + $0x38] sm:$0xf]  ;;  %v315_v60 = vpop.permute.xlu0 %314 }
  0xf9   :  { %v1237_v23 = vadd.bf16 %v1229_v57, %v1217_v47  ;;  %v1238_v15 = vadd.bf16 %v1230_v43, %v1218_v28  ;;  %3047 = vmatprep.subr.bf16.mxu0 %v3154_v24  ;;  %v1638_v5 = vadd.bf16 %v3862_v38, %v4246_v52  ;;  %5022 = vst [vmem:[#allocation57_spill] sm:$0xff] %v4338_v2  ;;  %v3156_v28 = vld [vmem:[#allocation9 + $0xa8] sm:$0xff]   ;;  %v214_v47 = vsel %vm199_vm0, 0, %v4268_v1  ;;  %v5024_v57 = vld [vmem:[#allocation33_spill] sm:$0xff]  ;;  %v5029_v1 = vld [vmem:[#allocation36_spill] sm:$0xff] }
  0xfa   :  { %v2177_v6 = vadd.bf16 %v3867_v41, %v4249_v13  ;;  %v2821_v18 = vcombine.low %v2191_v37, %v2192_v55  ;;  %v673_v8 = vmul.bf16 %v4004_v44, %v249_v62  ;;  %v1099_v38 = vadd.bf16 %v2751_v25, %v4232_v54  ;;  %v5023_v43 = vld [vmem:[#allocation30_spill] sm:$0xff]  ;;  %v5027_v55 = vld [vmem:[#allocation23_spill] sm:$0xff] }
  0xfb   :  { %v1245_v4 = vmax.bf16 %v4939_v10, %v1237_v23  ;;  %v1246_v39 = vmax.bf16 %v4939_v10, %v1238_v15  ;;  %v1639_v52 = vadd.bf16 %v3915_v29, %v4300_v35  ;;  %v637_v59 = vadd.bf16 %v2728_v14, %v561_v21  ;;  %v351_v54 = vpop.permute.xlu1 %350  ;;  %v5025_v35 = vld [vmem:[#allocation45_spill] sm:$0xff]  ;;  %v5026_v21 = vld [vmem:[#allocation46_spill] sm:$0xff] }
  0xfc   :  { %v1100_v41 = vadd.bf16 %v4325_v51, %v4328_v7  ;;  %v2759_v13 = vcombine.low %v1113_v0, %v1114_v53  ;;  %v1750_v46 = vmul.bf16 %v5023_v43, %v249_v62  ;;  %v2289_v29 = vmul.bf16 %v5024_v57, %v249_v62  ;;  %3048 = vmatpush3.bf16.msra.mxu0 %v3154_v24  ;;  %v5028_v15 = vld [vmem:[#allocation49_spill] sm:$0xff]  ;;  %v3157_v24 = vld [vmem:[#allocation9 + $0xe8] sm:$0xff]  }
  0xfd   :  { %3029 = vmatprep.mubr.bf16.mxu1 %v1245_v4  ;;  %v577_v37 = vmul.bf16 %v5025_v35, %v4108_v36  ;;  %v578_v14 = vmul.bf16 %v5026_v21, %v4108_v36  ;;  %v681_v25 = vadd.bf16 %v673_v8, %v637_v59  ;;  %v1211_v23 = vmul.bf16 %v4007_v9, %v249_v62  ;;  %v5031_v59 = vld [vmem:[#allocation37_spill] sm:$0xff] }
  0xfe   :  { %3030 = vmatmul.mubr.bf16.vlgmr.msra.gmra.mxu1 %v1246_v39  ;;  %v1714_v51 = vadd.bf16 %v5028_v15, %v1638_v5  ;;  %v2253_v7 = vadd.bf16 %v2821_v18, %v2177_v6  ;;  %v435_v0 = vmul.bf16 %v5029_v1, %v214_v47  ;;  %v1115_v53 = vmul.bf16 %v5025_v35, %v4181_v50  ;;  %v5033_v6 = vld [vmem:[#allocation26_spill] sm:$0xff]  ;;  %v3158_v15 = vld [vmem:[#allocation9 + $0xa0] sm:$0xff]  }
  0xff   :  { %3078 = vmatpush3.bf16.msra.mxu1 %v5027_v55  ;;  %v1116_v4 = vmul.bf16 %v5026_v21, %v4181_v50  ;;  %v4371_v39 = vsel %vm241_vm1, %v351_v54, 0  ;;  %3049 = vmatprep.subr.bf16.mxu0 %v3156_v28  ;;  %v1175_v8 = vadd.bf16 %v2759_v13, %v1099_v38  ;;  %v973_v62 = vmul.bf16 %v5031_v59, %v214_v47  ;;  %v5032_v55 = vld [vmem:[#allocation25_spill] sm:$0xff]  ;;  %v4382_v54 = vpop.permute.xlu0 %316 }
 0x100   :  { %3079 = vmatprep.subr.bf16.mxu1 %v3155_v42  ;;  %5030 = vst [vmem:[#allocation33_spill] sm:$0xff] %v4371_v39  ;;  %v1512_v5 = vmul.bf16 %v5032_v55, %v214_v47  ;;  %v2051_v18 = vmul.bf16 %v5033_v6, %v214_v47  ;;  %v4378_v58 = vadd.bf16 %v1750_v46, %v1714_v51  ;;  %v5038_v38 = vmov 0   ;;  %v3160_v51 = vld [vmem:[#allocation9 + $0x98] sm:$0xff]  }
 0x101   :  { %v4380_v10 = vadd.bf16 %v2289_v29, %v2253_v7  ;;  %v2729_v30 = vcombine.low %v577_v37, %v578_v14  ;;  %v4386_v13 = vmax.bf16 %v5038_v38, %v5037_v22  ;;  %v1219_v2 = vadd.bf16 %v1211_v23, %v1175_v8  ;;  %3050 = vmatpush3.bf16.msra.mxu0 %v3156_v28  ;;  %v5040_v29 = vld [vmem:[#allocation35_spill] sm:$0xff]  ;;  %v353_v22 = vpop.permute.xlu1 %352  ;;  %v3159_v23 = vld [vmem:[#allocation9 + $0xe0] sm:$0xff]   ;;  %v5041_v7 = vld [vmem:[#allocation42_spill] sm:$0xff] }
 0x102   :  { %5035 = vst [vmem:[#allocation45_spill] sm:$0xff] %v4378_v58  ;;  %v4390_v47 = vsel %vm241_vm1, %v4321_v48, 0  ;;  %v693_v26 = vmul.bf16 %v4251_v12, %v4371_v39  ;;  %v443_v37 = vadd.bf16 %v435_v0, %v5040_v29  ;;  %v2760_v14 = vcombine.low %v1115_v53, %v1116_v4  ;;  %v5042_v8 = vld [vmem:[#allocation27_spill] sm:$0xff]  ;;  %3051 = vmatprep.subr.bf16.mxu0 %v3158_v15 }
 0x103   :  { %5036 = vst [vmem:[#allocation46_spill] sm:$0xff] %v4380_v10  ;;  %3080 = vmatpush3.bf16.msra.mxu1 %v3155_v42  ;;  %5039 = vst [vmem:[#allocation23_spill] sm:$0xff] %v4386_v13  ;;  %v1231_v42 = vmul.bf16 %v4293_v49, %v4371_v39  ;;  %v981_v48 = vadd.bf16 %v973_v62, %v5041_v7  ;;  %v4401_v13 = vadd.bf16 %v1512_v5, %v5042_v8  ;;  %v5044_v10 = vld [vmem:[#allocation50_spill] sm:$0xff] }
 0x104   :  { %3081 = vmatprep.subr.bf16.mxu1 %v3157_v24  ;;  %v4404_v28 = vadd.bf16 %v2051_v18, %v3735_v27  ;;  %v2193_v46 = vmul.bf16 %v5025_v35, %v3800_v31  ;;  %v2194_v0 = vmul.bf16 %v5026_v21, %v3800_v31  ;;  %v5043_v53 = vadd.bf16 %v4272_v40, %v4279_v61  ;;  %v3185_v61 = vld [vmem:[#allocation3 + $0x20] sm:$0xf] }
 0x105   :  { %v674_v62 = vmul.bf16 %v4004_v44, %v4390_v47  ;;  %v4416_v5 = vadd.bf16 %v5044_v10, %v1639_v52  ;;  %v1212_v18 = vmul.bf16 %v4007_v9, %v4390_v47  ;;  %v4421_v35 = vsel %vm199_vm0, 0, %v315_v60  ;;  %3052 = vmatpush3.bf16.msra.mxu0 %v3158_v15  ;;  %v3186_v60 = vld [vmem:[#allocation3 + $0x24] sm:$0xf]  ;;  %v4443_v15 = vpop.permute.xlu1 %233 }
 0x106   :  { %v638_v4 = vadd.bf16 %v2729_v30, %v5043_v53  ;;  %v4424_v58 = vsel %vm241_vm1, %v353_v22, 0  ;;  %v701_v21 = vadd.bf16 %v693_v26, %v681_v25  ;;  %v1176_v40 = vadd.bf16 %v2760_v14, %v1100_v41  ;;  %3053 = vmatprep.subr.bf16.mxu0 %v3160_v51 }
 0x107   :  { %5045 = vst [vmem:[#allocation49_spill] sm:$0xff] %v4416_v5  ;;  %3082 = vmatpush3.bf16.msra.mxu1 %v3157_v24  ;;  %5046 = vst [vmem:[#allocation36_spill] sm:$0xff] %v4424_v58  ;;  %v4428_v30 = vsel %vm199_vm0, 0, %v4312_v63  ;;  %v503_v10 = vmul.bf16 %v3185_v61, %v4064_v3  ;;  %v1239_v52 = vadd.bf16 %v1231_v42, %v1219_v2  ;;  %v4431_v24 = vpop.permute.xlu0 %195  ;;  %v3161_v42 = vld [vmem:[#allocation9 + $0xd8] sm:$0xff]  }
 0x108   :  { %3083 = vmatprep.subr.bf16.mxu1 %v3159_v23  ;;  %v504_v53 = vmul.bf16 %v3186_v60, %v4064_v3  ;;  %v1041_v22 = vmul.bf16 %v3185_v61, %v4136_v17  ;;  %v1042_v26 = vmul.bf16 %v3186_v60, %v4136_v17  ;;  %v709_v41 = vmax.bf16 %v5038_v38, %v701_v21  ;;  %v3162_v61 = vld [vmem:[#allocation9 + $0x90] sm:$0xff]  }
 0x109   :  { %v455_v63 = vmul.bf16 %v3847_v32, %v4421_v35  ;;  %v694_v25 = vmul.bf16 %v4251_v12, %v4424_v58  ;;  %v1232_v2 = vmul.bf16 %v4293_v49, %v4424_v58  ;;  %v1247_v14 = vmax.bf16 %v5038_v38, %v1239_v52  ;;  %3054 = vmatpush3.bf16.msra.mxu0 %v3160_v51 }
 0x10a   :  { %v2822_v39 = vcombine.low %v2193_v46, %v2194_v0  ;;  %v682_v60 = vadd.bf16 %v674_v62, %v638_v4  ;;  %v993_v5 = vmul.bf16 %v3850_v33, %v4421_v35  ;;  %3001 = vmatprep.mubr.bf16.mxu0 %v709_v41  ;;  %v1220_v11 = vadd.bf16 %v1212_v18, %v1176_v40  ;;  %v3163_v46 = vld [vmem:[#allocation9 + $0xd0] sm:$0xff]   ;;  %v3187_v62 = vld [vmem:[#allocation3 + $0x28] sm:$0xf] }
 0x10b   :  { %3084 = vmatpush3.bf16.msra.mxu1 %v3159_v23  ;;  %v436_v58 = vmul.bf16 %v5029_v1, %v4428_v30  ;;  %v974_v19 = vmul.bf16 %v5031_v59, %v4428_v30  ;;  %v1513_v23 = vmul.bf16 %v5032_v55, %v4428_v30  ;;  %3033 = vmatprep.mubr.bf16.mxu1 %v1247_v14  ;;  %v4463_v18 = vsel %vm199_vm0, 0, %v4382_v54  ;;  %v198_v43 = vpop.permute.xlu0 %197  ;;  %v3164_v14 = vld [vmem:[#allocation9 + $0x88] sm:$0xff]  }
 0x10c   :  { %v4456_v0 = vcombine.low %v503_v10, %v504_v53  ;;  %v4458_v4 = vcombine.low %v1041_v22, %v1042_v26  ;;  %v505_v52 = vmul.bf16 %v3187_v62, %v4064_v3  ;;  %v4465_v40 = vadd.bf16 %v455_v63, %v443_v37  ;;  %3085 = vmatprep.subr.bf16.mxu1 %v3161_v42  ;;  %v3188_v53 = vld [vmem:[#allocation3 + $0x2c] sm:$0xf]  ;;  %v4476_v37 = vld [vmem:[#allocation7 + $0x20] sm:$0xf]  ;;  %v4484_v63 = vpop.permute.xlu1 %235 }
 0x10d   :  { %v702_v41 = vadd.bf16 %v694_v25, %v682_v60  ;;  %v1240_v21 = vadd.bf16 %v1232_v2, %v1220_v11  ;;  %3055 = vmatprep.subr.bf16.mxu0 %v3162_v61  ;;  %v4467_v10 = vadd.bf16 %v993_v5, %v981_v48  ;;  %v506_v22 = vmul.bf16 %v3188_v53, %v4064_v3  ;;  %v4480_v48 = vld [vmem:[#allocation7 + $0x24] sm:$0xf] }
 0x10e   :  { %v1043_v26 = vmul.bf16 %v3187_v62, %v4136_v17  ;;  %v1044_v55 = vmul.bf16 %v3188_v53, %v4136_v17  ;;  %v456_v54 = vmul.bf16 %v3847_v32, %v4463_v18  ;;  %v994_v11 = vmul.bf16 %v3850_v33, %v4463_v18  ;;  %5047 = vst [vmem:[#allocation37_spill] sm:$0xff] %v4476_v37 }
 0x10f   :  { %3086 = vmatpush3.bf16.msra.mxu1 %v3161_v42  ;;  %v579_v51 = vmul.bf16 %v4476_v37, %v4108_v36  ;;  %5048 = vst [vmem:[#allocation54_spill] sm:$0xff] %v4480_v48  ;;  %v580_v5 = vmul.bf16 %v4480_v48, %v4108_v36  ;;  %v1117_v25 = vmul.bf16 %v4476_v37, %v4181_v50  ;;  %v3165_v37 = vld [vmem:[#allocation9 + $0xc8] sm:$0xff]  }
 0x110   :  { %3087 = vmatprep.subr.bf16.mxu1 %v3163_v46  ;;  %v1118_v2 = vmul.bf16 %v4480_v48, %v4181_v50  ;;  %v710_v42 = vmax.bf16 %v5038_v38, %v702_v41  ;;  %v1248_v60 = vmax.bf16 %v5038_v38, %v1240_v21  ;;  %3056 = vmatpush3.bf16.msra.mxu0 %v3162_v61 }
 0x111   :  { %v444_v62 = vadd.bf16 %v436_v58, %v5040_v29  ;;  %v982_v53 = vadd.bf16 %v974_v19, %v5041_v7  ;;  %v2052_v56 = vmul.bf16 %v5033_v6, %v4428_v30  ;;  %v1532_v31 = vmul.bf16 %v3714_v16, %v4421_v35  ;;  %3057 = vmatprep.subr.bf16.mxu0 %v3164_v14  ;;  %v3166_v19 = vld [vmem:[#allocation9 + $0x80] sm:$0xff]  }
 0x112   :  { %v563_v48 = vadd.bf16 %v4456_v0, %v4465_v40  ;;  %v2071_v41 = vmul.bf16 %v3720_v20, %v4421_v35  ;;  %v4502_v21 = vcombine.low %v505_v52, %v506_v22  ;;  %v4506_v58 = vsel %vm199_vm0, 0, %v4431_v24  ;;  %3002 = vmatmul.mubr.bf16.gmra.mxu0 %v710_v42  ;;  %3034 = vmatmul.mubr.bf16.gmra.mxu1 %v1248_v60  ;;  %v319_v0 = vpop.permute.xlu0 %318 }
 0x113   :  { %v4508_v30 = vcombine.low %v1043_v26, %v1044_v55  ;;  %v4510_v61 = vadd.bf16 %v456_v54, %v444_v62  ;;  %v4512_v6 = vadd.bf16 %v994_v11, %v982_v53  ;;  %v2730_v16 = vcombine.low %v579_v51, %v580_v5  ;;  %3088 = vmatpush3.bf16.msra.mxu1 %v3163_v46  ;;  %v3167_v46 = vld [vmem:[#allocation9 + $0xc0] sm:$0xff]  }
 0x114   :  { %v5049_v35 = vadd.bf16 %v3925_v34, %v4315_v45  ;;  %v1101_v40 = vadd.bf16 %v4458_v4, %v4467_v10  ;;  %v2761_v55 = vcombine.low %v1117_v25, %v1118_v2  ;;  %3058 = vmatpush3.bf16.msra.mxu0 %v3164_v14  ;;  %v4524_v22 = vadd.bf16 %v1513_v23, %v5042_v8  ;;  %v4541_v23 = vld [vmem:[#allocation7 + $0x28] sm:$0xf]  ;;  %v4545_v10 = vld [vmem:[#allocation7 + $0x2c] sm:$0xf] }
 0x115   :  { %v4528_v26 = vsel %vm241_vm1, %v4443_v15, 0  ;;  %v437_v34 = vmul.bf16 %v5029_v1, %v4506_v58  ;;  %v4533_v45 = vsel %vm199_vm0, 0, %v198_v43  ;;  %3089 = vmatprep.subr.bf16.mxu1 %v3165_v37  ;;  %v4536_v4 = vadd.bf16 %v2052_v56, %v3735_v27  ;;  %3059 = vmatprep.subr.bf16.mxu0 %v3166_v19  ;;  %v4604_v27 = vld [vmem:[#allocation7 + $0x3c] sm:$0xf] }
 0x116   :  { %v4517_v52 = vadd.bf16 %v2822_v39, %v5049_v35  ;;  %5050 = vst [vmem:[#allocation35_spill] sm:$0xff] %v4533_v45  ;;  %v355_v39 = vpop.permute.xlu1 %354  ;;  %v4539_v14 = vadd.bf16 %v1532_v31, %v4401_v13  ;;  %v581_v15 = vmul.bf16 %v4541_v23, %v4108_v36  ;;  %v582_v43 = vmul.bf16 %v4545_v10, %v4108_v36 }
 0x117   :  { %v4550_v54 = vadd.bf16 %v2071_v41, %v4404_v28  ;;  %v564_v56 = vadd.bf16 %v4502_v21, %v4510_v61  ;;  %v639_v13 = vadd.bf16 %v2730_v16, %v563_v48  ;;  %3090 = vmatpush3.bf16.msra.mxu1 %v3165_v37  ;;  %v675_v11 = vmul.bf16 %v4004_v44, %v4528_v26  ;;  %v321_v48 = vpop.permute.xlu0 %320  ;;  %v3193_v41 = vld [vmem:[#allocation3 + $0x38] sm:$0xf] }
 0x118   :  { %v1177_v51 = vadd.bf16 %v2761_v55, %v1101_v40  ;;  %v438_v5 = vmul.bf16 %v5029_v1, %v4533_v45  ;;  %v976_v25 = vmul.bf16 %v5031_v59, %v4533_v45  ;;  %3060 = vmatpush3.bf16.msra.mxu0 %v3166_v19  ;;  %v1213_v28 = vmul.bf16 %v4007_v9, %v4528_v26  ;;  %v3194_v19 = vld [vmem:[#allocation3 + $0x3c] sm:$0xf] }
 0x119   :  { %v445_v2 = vadd.bf16 %v437_v34, %v5040_v29  ;;  %v975_v16 = vmul.bf16 %v5031_v59, %v4506_v58  ;;  %v1119_v37 = vmul.bf16 %v4541_v23, %v4181_v50  ;;  %3091 = vmatprep.subr.bf16.mxu1 %v3167_v46  ;;  %v2731_v42 = vcombine.low %v581_v15, %v582_v43  ;;  %v3196_v15 = vld [vmem:[#allocation3 + $0x34] sm:$0xf] }
 0x11a   :  { %v1120_v1 = vmul.bf16 %v4545_v10, %v4181_v50  ;;  %v4573_v60 = vsel %vm241_vm1, %v4484_v63, 0  ;;  %v4576_v62 = vsel %vm241_vm1, %v355_v39, 0  ;;  %v4579_v53 = vsel %vm199_vm0, 0, %v319_v0  ;;  %v357_v59 = vpop.permute.xlu1 %356  ;;  %v3195_v0 = vld [vmem:[#allocation3 + $0x30] sm:$0xf]  ;;  %5055 = vst [vmem:[#allocation59_spill] sm:$0xff] %v4604_v27 }
 0x11b   :  { %5051 = vst [vmem:[#allocation42_spill] sm:$0xff] %v4576_v62  ;;  %5052 = vst [vmem:[#allocation50_spill] sm:$0xff] %v4579_v53  ;;  %v509_v21 = vmul.bf16 %v3193_v41, %v4064_v3  ;;  %v510_v61 = vmul.bf16 %v3194_v19, %v4064_v3  ;;  %v1047_v35 = vmul.bf16 %v3193_v41, %v4136_v17  ;;  %3092 = vmatpush3.bf16.msra.mxu1 %v3167_v46 }
 0x11c   :  { %v446_v40 = vadd.bf16 %v438_v5, %v5040_v29  ;;  %v984_v63 = vadd.bf16 %v976_v25, %v5041_v7  ;;  %v1048_v55 = vmul.bf16 %v3194_v19, %v4136_v17  ;;  %v4588_v34 = vsel %vm199_vm0, 0, %v321_v48 }
 0x11d   :  { %5053 = vst [vmem:[#allocation58_spill] sm:$0xff] %v4588_v34  ;;  %v507_v39 = vmul.bf16 %v3195_v0, %v4064_v3  ;;  %v508_v43 = vmul.bf16 %v3196_v15, %v4064_v3  ;;  %v458_v24 = vmul.bf16 %v3847_v32, %v4588_v34  ;;  %v996_v46 = vmul.bf16 %v3850_v33, %v4588_v34  ;;  %v5054_v3 = vld [vmem:[#allocation57_spill] sm:$0xff] }
 0x11e   :  { %v1045_v29 = vmul.bf16 %v3195_v0, %v4136_v17  ;;  %v1046_v5 = vmul.bf16 %v3196_v15, %v4136_v17  ;;  %v457_v25 = vmul.bf16 %v3847_v32, %v4579_v53  ;;  %v995_v48 = vmul.bf16 %v3850_v33, %v4579_v53 }
 0x11f   :  { %v2725_v41 = vcombine.low %v509_v21, %v510_v61  ;;  %v2756_v19 = vcombine.low %v1047_v35, %v1048_v55  ;;  %v585_v31 = vmul.bf16 %v5054_v3, %v4108_v36  ;;  %v586_v34 = vmul.bf16 %v4604_v27, %v4108_v36  ;;  %v240_v35 = vpop.permute.xlu1 %239 }
 0x120   :  { %v466_v8 = vadd.bf16 %v458_v24, %v446_v40  ;;  %v1004_v0 = vadd.bf16 %v996_v46, %v984_v63  ;;  %v1123_v17 = vmul.bf16 %v5054_v3, %v4181_v50  ;;  %v1124_v32 = vmul.bf16 %v4604_v27, %v4181_v50 }
 0x121   :  { %v683_v15 = vadd.bf16 %v675_v11, %v639_v13  ;;  %v983_v33 = vadd.bf16 %v975_v16, %v5041_v7  ;;  %v695_v21 = vmul.bf16 %v4251_v12, %v4576_v62  ;;  %v1233_v61 = vmul.bf16 %v4293_v49, %v4576_v62 }
 0x122   :  { %v1221_v55 = vadd.bf16 %v1213_v28, %v1177_v51  ;;  %v2762_v53 = vcombine.low %v1119_v37, %v1120_v1  ;;  %v2724_v24 = vcombine.low %v507_v39, %v508_v43  ;;  %v465_v40 = vadd.bf16 %v457_v25, %v445_v2  ;;  %v238_v37 = vpop.permute.xlu0 %237 }
 0x123   :  { %v640_v63 = vadd.bf16 %v2731_v42, %v564_v56  ;;  %v676_v46 = vmul.bf16 %v4004_v44, %v4573_v60  ;;  %v2755_v3 = vcombine.low %v1045_v29, %v1046_v5  ;;  %v1003_v27 = vadd.bf16 %v995_v48, %v983_v33  ;;  %v4627_v42 = vld [vmem:[#allocation7 + $0x30] sm:$0xf]  ;;  %v361_v29 = vpop.permute.xlu1 %360  ;;  %v5057_v33 = vld [vmem:[#allocation24_spill] sm:$0xff] }
 0x124   :  { %v566_v13 = vadd.bf16 %v2725_v41, %v466_v8  ;;  %v1104_v11 = vadd.bf16 %v2756_v19, %v1004_v0  ;;  %v2733_v7 = vcombine.low %v585_v31, %v586_v34  ;;  %v2764_v16 = vcombine.low %v1123_v17, %v1124_v32  ;;  %v4631_v31 = vld [vmem:[#allocation7 + $0x34] sm:$0xf] }
 0x125   :  { %v1214_v45 = vmul.bf16 %v4007_v9, %v4573_v60  ;;  %v4622_v62 = vsel %vm241_vm1, %v240_v35, 0  ;;  %v703_v51 = vadd.bf16 %v695_v21, %v683_v15  ;;  %v1241_v28 = vadd.bf16 %v1233_v61, %v1221_v55  ;;  %v5058_v61 = vld [vmem:[#allocation31_spill] sm:$0xff]  ;;  %v5059_v35 = vld [vmem:[#allocation37_spill] sm:$0xff] }
 0x126   :  { %v565_v2 = vadd.bf16 %v2724_v24, %v465_v40  ;;  %v4625_v56 = vsel %vm241_vm1, %v357_v59, 0  ;;  %v583_v8 = vmul.bf16 %v4627_v42, %v4108_v36  ;;  %v584_v1 = vmul.bf16 %v4631_v31, %v4108_v36 }
 0x127   :  { %v711_v34 = vmax.bf16 %v5038_v38, %v703_v51  ;;  %v1249_v39 = vmax.bf16 %v5038_v38, %v1241_v28  ;;  %v1121_v43 = vmul.bf16 %v4627_v42, %v4181_v50  ;;  %v1122_v59 = vmul.bf16 %v4631_v31, %v4181_v50 }
 0x128   :  { %v1103_v5 = vadd.bf16 %v2755_v3, %v1003_v27  ;;  %v642_v25 = vadd.bf16 %v2733_v7, %v566_v13  ;;  %v678_v48 = vmul.bf16 %v4004_v44, %v4622_v62  ;;  %v1180_v41 = vadd.bf16 %v2764_v16, %v1104_v11 }
 0x129   :  { %v1216_v36 = vmul.bf16 %v4007_v9, %v4622_v62  ;;  %3005 = vmatprep.mubr.bf16.mxu0 %v711_v34  ;;  %3037 = vmatprep.mubr.bf16.mxu1 %v1249_v39  ;;  %v2732_v19 = vcombine.low %v583_v8, %v584_v1  ;;  %v2763_v0 = vcombine.low %v1121_v43, %v1122_v59  ;;  %v4646_v17 = vsel %vm241_vm1, %v238_v37, 0  ;;  %v5062_v43 = vld [vmem:[#allocation39_spill] sm:$0xff] }
 0x12a   :  { %v5056_v50 = vadd.bf16 %v4508_v30, %v4512_v6  ;;  %v696_v27 = vmul.bf16 %v4251_v12, %v4625_v56  ;;  %v1234_v3 = vmul.bf16 %v4293_v49, %v4625_v56  ;;  %v4656_v15 = vsel %vm241_vm1, %v361_v29, 0  ;;  %v359_v30 = vpop.permute.xlu0 %358 }
 0x12b   :  { %v1533_v21 = vmul.bf16 %v5057_v33, %v4463_v18  ;;  %v2195_v55 = vmul.bf16 %v5059_v35, %v5058_v61  ;;  %v677_v24 = vmul.bf16 %v4004_v44, %v4646_v17  ;;  %v1215_v6 = vmul.bf16 %v4007_v9, %v4646_v17 }
 0x12c   :  { %v1178_v32 = vadd.bf16 %v2762_v53, %v5056_v50  ;;  %v5060_v53 = vld [vmem:[#allocation54_spill] sm:$0xff]  ;;  %v684_v13 = vadd.bf16 %v676_v46, %v640_v63  ;;  %v686_v7 = vadd.bf16 %v678_v48, %v642_v25  ;;  %v1224_v16 = vadd.bf16 %v1216_v36, %v1180_v41  ;;  %v5063_v36 = vld [vmem:[#allocation32_spill] sm:$0xff] }
 0x12d   :  { %v2196_v40 = vmul.bf16 %v5060_v53, %v5058_v61  ;;  %v641_v51 = vadd.bf16 %v2732_v19, %v565_v2  ;;  %v1179_v28 = vadd.bf16 %v2763_v0, %v1103_v5  ;;  %v698_v37 = vmul.bf16 %v4251_v12, %v4656_v15  ;;  %v5061_v46 = vld [vmem:[#allocation38_spill] sm:$0xff]  ;;  %v5065_v19 = vld [vmem:[#allocation53_spill] sm:$0xff] }
 0x12e   :  { %v1222_v11 = vadd.bf16 %v1214_v45, %v1178_v32  ;;  %v1236_v8 = vmul.bf16 %v4293_v49, %v4656_v15  ;;  %v704_v44 = vadd.bf16 %v696_v27, %v684_v13  ;;  %v4673_v9 = vsel %vm241_vm1, %v359_v30, 0  ;;  %v5067_v32 = vld [vmem:[#allocation34_spill] sm:$0xff]  ;;  %v5070_v30 = vld [vmem:[#allocation56_spill] sm:$0xff]  ;;  %v5071_v13 = vld [vmem:[#allocation49_spill] sm:$0xff] }
 0x12f   :  { %v685_v34 = vadd.bf16 %v677_v24, %v641_v51  ;;  %v1223_v39 = vadd.bf16 %v1215_v6, %v1179_v28  ;;  %v697_v45 = vmul.bf16 %v4251_v12, %v4673_v9  ;;  %v1235_v63 = vmul.bf16 %v4293_v49, %v4673_v9  ;;  %v5064_v12 = vld [vmem:[#allocation52_spill] sm:$0xff] }
 0x130   :  { %v1242_v1 = vadd.bf16 %v1234_v3, %v1222_v11  ;;  %v1640_v2 = vadd.bf16 %v5061_v46, %v4539_v14  ;;  %v2179_v59 = vadd.bf16 %v5062_v43, %v4550_v54  ;;  %v712_v29 = vmax.bf16 %v5038_v38, %v704_v44  ;;  %v5068_v54 = vld [vmem:[#allocation55_spill] sm:$0xff]  ;;  %v5072_v11 = vld [vmem:[#allocation30_spill] sm:$0xff]  ;;  %v5079_v43 = vld [vmem:[#allocation25_spill] sm:$0xff] }
 0x131   :  { %v2072_v25 = vmul.bf16 %v3720_v20, %v4463_v18  ;;  %v705_v48 = vadd.bf16 %v697_v45, %v685_v34  ;;  %v1243_v41 = vadd.bf16 %v1235_v63, %v1223_v39  ;;  %v5066_v0 = vmul.bf16 %v5064_v12, %v5065_v19  ;;  %v5077_v34 = vld [vmem:[#allocation40_spill] sm:$0xff]  ;;  %v5078_v45 = vld [vmem:[#allocation51_spill] sm:$0xff] }
 0x132   :  { %v1250_v5 = vmax.bf16 %v5038_v38, %v1242_v1  ;;  %3006 = vmatmul.mubr.bf16.gmra.mxu0 %v712_v29  ;;  %v706_v14 = vadd.bf16 %v698_v37, %v686_v7  ;;  %v1244_v50 = vadd.bf16 %v1236_v8, %v1224_v16  ;;  %v5069_v27 = vmul.bf16 %v5068_v54, %v5065_v19  ;;  %v5080_v29 = vld [vmem:[#allocation26_spill] sm:$0xff] }
 0x133   :  { %v1776_v49 = vadd.bf16 %v5066_v0, %v5063_v36  ;;  %v1541_v35 = vadd.bf16 %v1533_v21, %v4524_v22  ;;  %v2823_v24 = vcombine.low %v2195_v55, %v2196_v40  ;;  %v713_v18 = vmax.bf16 %v5038_v38, %v705_v48  ;;  %v5075_v22 = vld [vmem:[#allocation33_spill] sm:$0xff]  ;;  %v5076_v40 = vld [vmem:[#allocation36_spill] sm:$0xff]  ;;  %v5082_v48 = vld [vmem:[#allocation20_spill] sm:$0xff] }
 0x134   :  { %3038 = vmatmul.mubr.bf16.gmra.mxu1 %v1250_v5  ;;  %v2315_v3 = vadd.bf16 %v5069_v27, %v5067_v32  ;;  %v1251_v6 = vmax.bf16 %v5038_v38, %v1243_v41  ;;  %v2324_v53 = vmax.bf16 %v5038_v38, %v5070_v30  ;;  %v5073_v7 = vmul.bf16 %v5072_v11, %v4390_v47 }
 0x135   :  { %v5074_v51 = vmul.bf16 %v5024_v57, %v4390_v47  ;;  %v1770_v21 = vmul.bf16 %v5064_v12, %v5075_v22  ;;  %v2309_v55 = vmul.bf16 %v5068_v54, %v5075_v22  ;;  %v1771_v37 = vmul.bf16 %v5064_v12, %v5076_v40  ;;  %3009 = vmatprep.mubr.bf16.mxu0 %v713_v18 }
 0x136   :  { %v4704_v16 = vadd.bf16 %v5073_v7, %v5071_v13  ;;  %v2080_v8 = vadd.bf16 %v2072_v25, %v4536_v4  ;;  %3041 = vmatprep.mubr.bf16.mxu1 %v1251_v6  ;;  %v1752_v44 = vmul.bf16 %v5072_v11, %v4528_v26  ;;  %v2291_v47 = vmul.bf16 %v5024_v57, %v4528_v26  ;;  %v5081_v25 = vld [vmem:[#allocation29_spill] sm:$0xff]  ;;  %v5090_v13 = vld [vmem:[#allocation28_spill] sm:$0xff] }
 0x137   :  { %v4710_v28 = vadd.bf16 %v5074_v51, %v4517_v52  ;;  %v714_v52 = vmax.bf16 %v5038_v38, %v706_v14  ;;  %v1252_v1 = vmax.bf16 %v5038_v38, %v1244_v50  ;;  %v1641_v39 = vadd.bf16 %v5077_v34, %v1541_v35  ;;  %v5084_v26 = vld [vmem:[#allocation19_spill] sm:$0xff]  ;;  %v5093_v34 = vld [vmem:[#allocation46_spill] sm:$0xff] }
 0x138   :  { %v1716_v63 = vadd.bf16 %v5078_v45, %v1640_v2  ;;  %v2255_v46 = vadd.bf16 %v2823_v24, %v2179_v59  ;;  %v1514_v4 = vmul.bf16 %v5079_v43, %v4506_v58  ;;  %v2053_v5 = vmul.bf16 %v5080_v29, %v4506_v58  ;;  %v5086_v14 = vld [vmem:[#allocation41_spill] sm:$0xff]  ;;  %v5087_v24 = vld [vmem:[#allocation35_spill] sm:$0xff] }
 0x139   :  { %v5083_v41 = vmul.bf16 %v5081_v25, %v5082_v48  ;;  %v5085_v36 = vmul.bf16 %v5081_v25, %v5084_v26  ;;  %v2197_v0 = vmul.bf16 %v4541_v23, %v5058_v61  ;;  %v2198_v2 = vmul.bf16 %v4545_v10, %v5058_v61  ;;  %v5088_v10 = vld [vmem:[#allocation50_spill] sm:$0xff] }
 0x13a   :  { %v2310_v59 = vmul.bf16 %v5068_v54, %v5076_v40  ;;  %v2180_v50 = vadd.bf16 %v5086_v14, %v2080_v8  ;;  %v1784_v58 = vmax.bf16 %v5038_v38, %v1776_v49  ;;  %v2323_v32 = vmax.bf16 %v5038_v38, %v2315_v3  ;;  %3010 = vmatmul.mubr.bf16.gmra.mxu0 %v714_v52  ;;  %v5089_v49 = vld [vmem:[#allocation27_spill] sm:$0xff]  ;;  %v5091_v8 = vld [vmem:[#allocation58_spill] sm:$0xff]  ;;  %v5092_v52 = vld [vmem:[#allocation45_spill] sm:$0xff] }
 0x13b   :  { %v2793_v19 = vcombine.low %v5085_v36, %v5083_v41  ;;  %v1760_v27 = vadd.bf16 %v1752_v44, %v1716_v63  ;;  %v2299_v35 = vadd.bf16 %v2291_v47, %v2255_v46  ;;  %v1515_v18 = vmul.bf16 %v5079_v43, %v5087_v24  ;;  %v5094_v43 = vld [vmem:[#allocation42_spill] sm:$0xff]  ;;  %v5096_v14 = vld [vmem:[#allocation57_spill] sm:$0xff] }
 0x13c   :  { %3042 = vmatmul.mubr.bf16.gmra.mxu1 %v1252_v1  ;;  %v2054_v23 = vmul.bf16 %v5080_v29, %v5087_v24  ;;  %v1534_v6 = vmul.bf16 %v5057_v33, %v5088_v10  ;;  %v2073_v30 = vmul.bf16 %v3720_v20, %v5088_v10  ;;  %3061 = vmatprep.mubr.bf16.mxu0 %v1784_v58  ;;  %v5097_v24 = vld [vmem:[#allocation23_spill] sm:$0xff] }
 0x13d   :  { %3093 = vmatprep.mubr.bf16.mxu1 %v2323_v32  ;;  %v1522_v3 = vadd.bf16 %v1514_v4, %v5089_v49  ;;  %v2061_v7 = vadd.bf16 %v2053_v5, %v5090_v13  ;;  %v2824_v51 = vcombine.low %v2197_v0, %v2198_v2  ;;  %v1717_v22 = vadd.bf16 %v2793_v19, %v1641_v39  ;;  %v5095_v0 = vld [vmem:[#allocation59_spill] sm:$0xff] }
 0x13e   :  { %v1535_v44 = vmul.bf16 %v5057_v33, %v5091_v8  ;;  %v2074_v47 = vmul.bf16 %v3720_v20, %v5091_v8  ;;  %v1778_v1 = vadd.bf16 %v1770_v21, %v5092_v52  ;;  %v2317_v45 = vadd.bf16 %v2309_v55, %v5093_v34  ;;  %v5101_v8 = vld [vmem:[#allocation48_spill] sm:$0xff] }
 0x13f   :  { %v1753_v63 = vmul.bf16 %v5072_v11, %v4573_v60  ;;  %v2292_v46 = vmul.bf16 %v5024_v57, %v4573_v60  ;;  %v1772_v4 = vmul.bf16 %v5064_v12, %v5094_v43  ;;  %v2311_v39 = vmul.bf16 %v5068_v54, %v5094_v43 }
 0x140   :  { %v1523_v33 = vadd.bf16 %v1515_v18, %v5089_v49  ;;  %v2062_v20 = vadd.bf16 %v2054_v23, %v5090_v13  ;;  %v1542_v29 = vadd.bf16 %v1534_v6, %v1522_v3  ;;  %v2081_v21 = vadd.bf16 %v2073_v30, %v2061_v7  ;;  %v5099_v23 = vld [vmem:[#allocation44_spill] sm:$0xff] }
 0x141   :  { %v1660_v55 = vmul.bf16 %v4627_v42, %v5081_v25  ;;  %v1661_v5 = vmul.bf16 %v4631_v31, %v5081_v25  ;;  %v2199_v60 = vmul.bf16 %v4627_v42, %v5058_v61  ;;  %v2200_v48 = vmul.bf16 %v4631_v31, %v5058_v61  ;;  %v5098_v31 = vld [vmem:[#allocation43_spill] sm:$0xff] }
 0x142   :  { %v1543_v41 = vadd.bf16 %v1535_v44, %v1523_v33  ;;  %v2082_v26 = vadd.bf16 %v2074_v47, %v2062_v20  ;;  %v1786_v36 = vmax.bf16 %v5038_v38, %v1778_v1  ;;  %v2325_v19 = vmax.bf16 %v5038_v38, %v2317_v45  ;;  %3062 = vmatmul.mubr.bf16.vlgmr.msra.gmra.mxu0 %v5097_v24 }
 0x143   :  { %v1663_v2 = vmul.bf16 %v5095_v0, %v5081_v25  ;;  %v2201_v58 = vmul.bf16 %v5096_v14, %v5058_v61  ;;  %v2202_v32 = vmul.bf16 %v5095_v0, %v5058_v61  ;;  %v2256_v42 = vadd.bf16 %v2824_v51, %v2180_v50  ;;  %v5100_v50 = vld [vmem:[#allocation47_spill] sm:$0xff] }
 0x144   :  { %3094 = vmatmul.mubr.bf16.vlgmr.msra.gmra.mxu1 %v2324_v53  ;;  %v1642_v18 = vadd.bf16 %v5098_v31, %v1542_v29  ;;  %v2181_v10 = vadd.bf16 %v5099_v23, %v2081_v21  ;;  %3065 = vmatprep.mubr.bf16.mxu0 %v1786_v36  ;;  %v2794_v6 = vcombine.low %v1660_v55, %v1661_v5 }
 0x145   :  { %3097 = vmatprep.mubr.bf16.mxu1 %v2325_v19  ;;  %v2825_v30 = vcombine.low %v2199_v60, %v2200_v48  ;;  %v1779_v49 = vadd.bf16 %v1771_v37, %v4704_v16  ;;  %v2318_v3 = vadd.bf16 %v2310_v59, %v4710_v28  ;;  %v1761_v61 = vadd.bf16 %v1753_v63, %v1717_v22 }
 0x146   :  { %v2300_v13 = vadd.bf16 %v2292_v46, %v2256_v42  ;;  %v1780_v7 = vadd.bf16 %v1772_v4, %v1760_v27  ;;  %v2319_v53 = vadd.bf16 %v2311_v39, %v2299_v35  ;;  %v1643_v51 = vadd.bf16 %v5100_v50, %v1543_v41 }
 0x147   :  { %v2182_v44 = vadd.bf16 %v5101_v8, %v2082_v26  ;;  %v5102_v47 = vmul.bf16 %v5096_v14, %v5081_v25  ;;  %v2826_v1 = vcombine.low %v2201_v58, %v2202_v32  ;;  %v1773_v34 = vmul.bf16 %v5064_v12, %v4625_v56 }
 0x148   :  { %v2312_v16 = vmul.bf16 %v5068_v54, %v4625_v56  ;;  %v1754_v28 = vmul.bf16 %v5072_v11, %v4646_v17  ;;  %v2293_v40 = vmul.bf16 %v5024_v57, %v4646_v17  ;;  %v1718_v37 = vadd.bf16 %v2794_v6, %v1642_v18 }
 0x149   :  { %v2795_v52 = vcombine.low %v5102_v47, %v1663_v2  ;;  %v2257_v59 = vadd.bf16 %v2825_v30, %v2181_v10  ;;  %v1787_v27 = vmax.bf16 %v5038_v38, %v1779_v49  ;;  %v2326_v25 = vmax.bf16 %v5038_v38, %v2318_v3 }
 0x14a   :  { %v1774_v35 = vmul.bf16 %v5064_v12, %v4673_v9  ;;  %v2313_v22 = vmul.bf16 %v5068_v54, %v4673_v9  ;;  %v1788_v56 = vmax.bf16 %v5038_v38, %v1780_v7  ;;  %v2327_v45 = vmax.bf16 %v5038_v38, %v2319_v53 }
 0x14b   :  { %v1719_v63 = vadd.bf16 %v2795_v52, %v1643_v51  ;;  %v1755_v17 = vmul.bf16 %v5072_v11, %v4622_v62  ;;  %v2258_v46 = vadd.bf16 %v2826_v1, %v2182_v44  ;;  %3066 = vmatmul.mubr.bf16.gmra.mxu0 %v1787_v27  ;;  %v2294_v43 = vmul.bf16 %v5024_v57, %v4622_v62 }
 0x14c   :  { %3098 = vmatmul.mubr.bf16.gmra.mxu1 %v2326_v25  ;;  %v1762_v4 = vadd.bf16 %v1754_v28, %v1718_v37  ;;  %v2301_v39 = vadd.bf16 %v2293_v40, %v2257_v59  ;;  %3069 = vmatprep.mubr.bf16.mxu0 %v1788_v56  ;;  %v1781_v33 = vadd.bf16 %v1773_v34, %v1761_v61 }
 0x14d   :  { %3101 = vmatprep.mubr.bf16.mxu1 %v2327_v45  ;;  %v2320_v9 = vadd.bf16 %v2312_v16, %v2300_v13  ;;  %v1763_v21 = vadd.bf16 %v1755_v17, %v1719_v63  ;;  %v2302_v55 = vadd.bf16 %v2294_v43, %v2258_v46  ;;  %v1775_v5 = vmul.bf16 %v5064_v12, %v4656_v15  ;;  %v4864_v63 = vld [vmem:[%s5103_s15] ss:$0 sm:$0xff] }
 0x14e   :  { %v1782_v20 = vadd.bf16 %v1774_v35, %v1762_v4  ;;  %v2321_v29 = vadd.bf16 %v2313_v22, %v2301_v39  ;;  %v2314_v11 = vmul.bf16 %v5068_v54, %v4656_v15  ;;  %v1789_v60 = vmax.bf16 %v5038_v38, %v1781_v33 }
 0x14f   :  { %v2328_v57 = vmax.bf16 %v5038_v38, %v2320_v9  ;;  %v1783_v41 = vadd.bf16 %v1775_v5, %v1763_v21 }
 0x150   :  { %v1790_v62 = vmax.bf16 %v5038_v38, %v1782_v20  ;;  %v2329_v48 = vmax.bf16 %v5038_v38, %v2321_v29  ;;  %v2322_v26 = vadd.bf16 %v2314_v11, %v2302_v55 }
 0x151   :  { %v1791_v36 = vmax.bf16 %v5038_v38, %v1783_v41 }
 0x152   :  { %v2330_v12 = vmax.bf16 %v5038_v38, %v2322_v26 }
 0x153   :  { %3070 = vmatmul.mubr.bf16.gmra.mxu0 %v1789_v60 }
 0x154   :  { %3102 = vmatmul.mubr.bf16.gmra.mxu1 %v2328_v57  ;;  %3073 = vmatprep.mubr.bf16.mxu0 %v1790_v62 }
 0x155   :  { %3105 = vmatprep.mubr.bf16.mxu1 %v2329_v48 }
 0x15b   :  { %3074 = vmatmul.mubr.bf16.gmra.mxu0 %v1791_v36 }
 0x15c   :  { %3106 = vmatmul.mubr.bf16.gmra.mxu1 %v2330_v12 }
 0x1b7   :  { %v2999_v15 = vpop.f32.mrf.mxu0 }
 0x1b9   :  { %v829_v19 = vpop.f32.mrf.mxu0 }
 0x1bb   :  { %v3000_v2 = vpop.f32.mrf.mxu0 }
 0x1bd   :  { %v832_v58 = vpop.f32.mrf.mxu0 }
 0x1be   :  { %v3031_v54 = vpop.f32.mrf.mxu1 }
 0x1bf   :  { %v1433_v28 = vadd.f32 %v3031_v54, %v2999_v15 }
 0x1c0   :  { %v1368_v0 = vpop.f32.mrf.mxu1 }
 0x1c1   :  { %v1431_v59 = vadd.f32 %v1368_v0, %v829_v19 }
 0x1c2   :  { %v3032_v14 = vpop.f32.mrf.mxu1 }
 0x1c3   :  { %v1434_v22 = vadd.f32 %v3032_v14, %v3000_v2 }
 0x1c4   :  { %v1371_v32 = vpop.f32.mrf.mxu1 }
 0x1c5   :  { %v1432_v43 = vadd.f32 %v1371_v32, %v832_v58 }
 0x1d2   :  { %v3003_v24 = vpop.f32.mrf.mxu0  ;;  %v3035_v42 = vpop.f32.mrf.mxu1 }
 0x1d3   :  { %v1437_v20 = vadd.f32 %v3035_v42, %v3003_v24 }
 0x1d4   :  { %v845_v31 = vpop.f32.mrf.mxu0  ;;  %v1384_v18 = vpop.f32.mrf.mxu1 }
 0x1d5   :  { %v1435_v5 = vadd.f32 %v1384_v18, %v845_v31 }
 0x1d6   :  { %v3004_v23 = vpop.f32.mrf.mxu0  ;;  %v3036_v10 = vpop.f32.mrf.mxu1 }
 0x1d7   :  { %v1438_v0 = vadd.f32 %v3036_v10, %v3004_v23 }
 0x1d8   :  { %v848_v6 = vpop.f32.mrf.mxu0  ;;  %v1387_v30 = vpop.f32.mrf.mxu1 }
 0x1d9   :  { %v1436_v2 = vadd.f32 %v1387_v30, %v848_v6 }
 0x1f2   :  { %v4831_v49 = vpop.f32.mrf.mxu0 }
 0x1f4   :  { %v3039_v38 = vpop.f32.mrf.mxu1  ;;  %v4833_v3 = vpop.f32.mrf.mxu0 }
 0x1f6   :  { %v4835_v61 = vpop.f32.mrf.mxu1  ;;  %v4837_v13 = vpop.f32.mrf.mxu0 }
 0x1f7   :  { %v1439_v6 = vadd.f32 %v4835_v61, %v4833_v3 }
 0x1f8   :  { %v4839_v7 = vpop.f32.mrf.mxu1  ;;  %v4841_v53 = vpop.f32.mrf.mxu0 }
 0x1fa   :  { %v4843_v50 = vpop.f32.mrf.mxu1  ;;  %v4845_v51 = vpop.f32.mrf.mxu0 }
 0x1fc   :  { %v4847_v8 = vpop.f32.mrf.mxu1  ;;  %v4849_v44 = vpop.f32.mrf.mxu0 }
 0x1fe   :  { %v4851_v47 = vpop.f32.mrf.mxu1  ;;  %v4853_v52 = vpop.f32.mrf.mxu0 }
 0x200   :  { %v4855_v1 = vpop.f32.mrf.mxu1  ;;  %v4857_v34 = vpop.f32.mrf.mxu0 }
 0x202   :  { %v4859_v16 = vpop.f32.mrf.mxu1  ;;  %v3063_v40 = vpop.f32.mrf.mxu0 }
 0x203   :  { %v1972_v27 = vadd.f32 %v3063_v40, %v1433_v28 }
 0x204   :  { %v3095_v37 = vpop.f32.mrf.mxu1  ;;  %v1907_v25 = vpop.f32.mrf.mxu0 }
 0x205   :  { %v2511_v56 = vadd.f32 %v3095_v37, %v1972_v27  ;;  %v1970_v45 = vadd.f32 %v1907_v25, %v1431_v59  ;;  %v1441_v59 = vadd.f32 %v3039_v38, %v4831_v49  ;;  %v1442_v38 = vadd.f32 %v4839_v7, %v4837_v13 }
 0x206   :  { %v2446_v35 = vpop.f32.mrf.mxu1  ;;  %v3064_v17 = vpop.f32.mrf.mxu0  ;;  %v1445_v13 = vadd.f32 %v4847_v8, %v4845_v51 }
 0x207   :  { %v2509_v4 = vadd.f32 %v2446_v35, %v1970_v45  ;;  %v1973_v39 = vadd.f32 %v3064_v17, %v1434_v22  ;;  %v2569_v29 = vadd.f32 %v4864_v63, %v2511_v56 }
 0x208   :  { %v3096_v46 = vpop.f32.mrf.mxu1  ;;  %v1910_v33 = vpop.f32.mrf.mxu0 }
 0x209   :  { %v2512_v21 = vadd.f32 %v3096_v46, %v1973_v39  ;;  %v1971_v55 = vadd.f32 %v1910_v33, %v1432_v43  ;;  %v2567_v57 = vadd.f32 %v4864_v63, %v2509_v4  ;;  %v2585_v12 = vmax.f32 %v2569_v29, 0.0 }
 0x20a   :  { %v2449_v9 = vpop.f32.mrf.mxu1 }
 0x20b   :  { %v3067_v11 = vpop.f32.mrf.mxu0  ;;  %v2570_v62 = vadd.f32 %v4864_v63, %v2512_v21  ;;  %v2510_v48 = vadd.f32 %v2449_v9, %v1971_v55  ;;  %v2583_v24 = vmax.f32 %v2567_v57, 0.0  ;;  %v1440_v55 = vadd.f32 %v4843_v50, %v4841_v53 }
 0x20c   :  { %v3099_v60 = vpop.f32.mrf.mxu1  ;;  %v1976_v41 = vadd.f32 %v3067_v11, %v1437_v20 }
 0x20d   :  { %v1923_v26 = vpop.f32.mrf.mxu0  ;;  %v2586_v15 = vmax.f32 %v2570_v62, 0.0  ;;  %v2568_v54 = vadd.f32 %v4864_v63, %v2510_v48 }
 0x20e   :  { %v2462_v36 = vpop.f32.mrf.mxu1  ;;  %v1974_v19 = vadd.f32 %v1923_v26, %v1435_v5  ;;  %v2515_v14 = vadd.f32 %v3099_v60, %v1976_v41 }
 0x20f   :  { %v3068_v58 = vpop.f32.mrf.mxu0  ;;  %v2878_v42 = vpack.c.bf16 %v2586_v15, %v2585_v12  ;;  %v2584_v31 = vmax.f32 %v2568_v54, 0.0  ;;  %v1443_v12 = vadd.f32 %v4851_v47, %v4849_v44  ;;  %v1446_v15 = vadd.f32 %v4855_v1, %v4853_v52 }
 0x210   :  { %v3100_v32 = vpop.f32.mrf.mxu1  ;;  %v2513_v18 = vadd.f32 %v2462_v36, %v1974_v19  ;;  %v1977_v28 = vadd.f32 %v3068_v58, %v1438_v0  ;;  %v2573_v35 = vadd.f32 %v4864_v63, %v2515_v14  ;;  %v1444_v47 = vadd.f32 %v4859_v16, %v4857_v34 }
 0x211   :  { %v1926_v40 = vpop.f32.mrf.mxu0  ;;  %2910 = vst [vmem:[#allocation13 + $0x8] sm:$0xff] %v2878_v42   ;;  %v2873_v27 = vpack.c.bf16 %v2584_v31, %v2583_v24 }
 0x212   :  { %v2465_v37 = vpop.f32.mrf.mxu1  ;;  %v1975_v25 = vadd.f32 %v1926_v40, %v1436_v2  ;;  %v2516_v22 = vadd.f32 %v3100_v32, %v1977_v28  ;;  %v2571_v30 = vadd.f32 %v4864_v63, %v2513_v18  ;;  %v2589_v33 = vmax.f32 %v2573_v35, 0.0 }
 0x213   :  { %v3071_v23 = vpop.f32.mrf.mxu0  ;;  %2874 = vst [vmem:[#allocation13] sm:$0xff] %v2873_v27  }
 0x214   :  { %v3103_v10 = vpop.f32.mrf.mxu1  ;;  %v2514_v56 = vadd.f32 %v2465_v37, %v1975_v25  ;;  %v1980_v45 = vadd.f32 %v3071_v23, %v1441_v59  ;;  %v2574_v17 = vadd.f32 %v4864_v63, %v2516_v22  ;;  %v2587_v61 = vmax.f32 %v2571_v30, 0.0 }
 0x215   :  { %v1939_v46 = vpop.f32.mrf.mxu0 }
 0x216   :  { %v2478_v49 = vpop.f32.mrf.mxu1  ;;  %v2572_v43 = vadd.f32 %v4864_v63, %v2514_v56  ;;  %v2519_v4 = vadd.f32 %v3103_v10, %v1980_v45  ;;  %v1978_v39 = vadd.f32 %v1939_v46, %v1439_v6  ;;  %v2590_v9 = vmax.f32 %v2574_v17, 0.0 }
 0x217   :  { %v3072_v20 = vpop.f32.mrf.mxu0 }
 0x218   :  { %v3104_v3 = vpop.f32.mrf.mxu1  ;;  %v2588_v29 = vmax.f32 %v2572_v43, 0.0  ;;  %v1981_v21 = vadd.f32 %v3072_v20, %v1442_v38  ;;  %v2888_v5 = vpack.c.bf16 %v2590_v9, %v2589_v33  ;;  %v2517_v11 = vadd.f32 %v2478_v49, %v1978_v39 }
 0x219   :  { %v1942_v60 = vpop.f32.mrf.mxu0  ;;  %v2577_v62 = vadd.f32 %v4864_v63, %v2519_v4 }
 0x21a   :  { %v2481_v57 = vpop.f32.mrf.mxu1  ;;  %v2883_v7 = vpack.c.bf16 %v2588_v29, %v2587_v61  ;;  %v2520_v48 = vadd.f32 %v3104_v3, %v1981_v21  ;;  %2912 = vst [vmem:[#allocation13 + $0x18] sm:$0xff] %v2888_v5   ;;  %v1979_v41 = vadd.f32 %v1942_v60, %v1440_v55  ;;  %v2575_v51 = vadd.f32 %v4864_v63, %v2517_v11 }
 0x21b   :  { %v3075_v26 = vpop.f32.mrf.mxu0  ;;  %v2593_v0 = vmax.f32 %v2577_v62, 0.0 }
 0x21c   :  { %v3107_v36 = vpop.f32.mrf.mxu1  ;;  %2911 = vst [vmem:[#allocation13 + $0x10] sm:$0xff] %v2883_v7   ;;  %v2578_v53 = vadd.f32 %v4864_v63, %v2520_v48  ;;  %v1984_v50 = vadd.f32 %v3075_v26, %v1445_v13  ;;  %v2518_v8 = vadd.f32 %v2481_v57, %v1979_v41  ;;  %v2591_v52 = vmax.f32 %v2575_v51, 0.0 }
 0x21d   :  { %v1955_v54 = vpop.f32.mrf.mxu0 }
 0x21e   :  { %v2494_v19 = vpop.f32.mrf.mxu1  ;;  %v2594_v2 = vmax.f32 %v2578_v53, 0.0  ;;  %v2523_v14 = vadd.f32 %v3107_v36, %v1984_v50  ;;  %v1982_v58 = vadd.f32 %v1955_v54, %v1443_v12  ;;  %v2576_v32 = vadd.f32 %v4864_v63, %v2518_v8 }
 0x21f   :  { %v3076_v24 = vpop.f32.mrf.mxu0 }
 0x220   :  { %v3108_v44 = vpop.f32.mrf.mxu1  ;;  %v2898_v42 = vpack.c.bf16 %v2594_v2, %v2593_v0  ;;  %v2521_v31 = vadd.f32 %v2494_v19, %v1982_v58  ;;  %v1985_v18 = vadd.f32 %v3076_v24, %v1446_v15  ;;  %v2592_v1 = vmax.f32 %v2576_v32, 0.0 }
 0x221   :  { %v1958_v28 = vpop.f32.mrf.mxu0  ;;  %v2581_v40 = vadd.f32 %v4864_v63, %v2523_v14 }
 0x222   :  { %2914 = vst [vmem:[#allocation13 + $0x28] sm:$0xff] %v2898_v42   ;;  %v2524_v37 = vadd.f32 %v3108_v44, %v1985_v18  ;;  %v1983_v59 = vadd.f32 %v1958_v28, %v1444_v47  ;;  %v2893_v27 = vpack.c.bf16 %v2592_v1, %v2591_v52  ;;  %v2497_v25 = vpop.f32.mrf.mxu1  ;;  %v2579_v35 = vadd.f32 %v4864_v63, %v2521_v31 }
 0x223   :  { %v2597_v34 = vmax.f32 %v2581_v40, 0.0 }
 0x224   :  { %v2582_v22 = vadd.f32 %v4864_v63, %v2524_v37  ;;  %v2522_v23 = vadd.f32 %v2497_v25, %v1983_v59  ;;  %2913 = vst [vmem:[#allocation13 + $0x20] sm:$0xff] %v2893_v27   ;;  %v2595_v6 = vmax.f32 %v2579_v35, 0.0 }
 0x226   :  { %v2598_v16 = vmax.f32 %v2582_v22, 0.0  ;;  %v2580_v10 = vadd.f32 %v4864_v63, %v2522_v23 }
 0x228   :  { %v2908_v30 = vpack.c.bf16 %v2598_v16, %v2597_v34  ;;  %v2596_v56 = vmax.f32 %v2580_v10, 0.0 }
 0x22a   :  { %2916 = vst [vmem:[#allocation13 + $0x38] sm:$0xff] %v2908_v30   ;;  %v2903_v45 = vpack.c.bf16 %v2596_v56, %v2595_v6 }
 0x22c   :  { %2915 = vst [vmem:[#allocation13 + $0x30] sm:$0xff] %v2903_v45  }
 0x22d   :  { %3295 = shalt.err (!%p3292_p1)
}
 0x22e   :  { %s5104_s18 = smov 4   ;;  %s5105_s1 = smov 64  }
 0x22f   :  { %s5106_s2 = sld [smem:[#allocation61_spill]] }
 0x235   :  { %2690 = dma.vmem_to_hbm [thread:$0]  %s2685_s0, 1024, %s5106_s2, [#allocation5], %s5105_s1, %s5105_s1, %s5104_s18  }
 0x236   :  { %3312 = dma.done.wait [#allocation5], 1024  }
 0x237   :  { %3313 = vsyncadd [#allocation5], 4294966272 }
 0x238   :  { %2694 = vsyncpa [#allocation4], 1 }
 0x239   :  { %2695 = vsyncpa [#allocation8], 1 }
 0x23a   :  { %2696 = vsyncpa [#allocation5], 1 }
 0x23b   :  { %2697 = vsyncpa [#allocation6], 1 }
 0x23c   :  { %2698 = vsyncpa [#allocation12], 1 }

</bundles_post_ra>
